<compile_context>
chip_gen: v6e
topology: v6e:2x2x1
jax: 0.10.0
libtpu: 0.0.40
codegen_flags: <defaults>
</compile_context>

<pallas_src>
import math
import functools

import jax
import jax.numpy as jnp
from jax.experimental import pallas as pl
from jax.experimental.pallas import tpu as pltpu


# ----------------------------------------------------------------------------
# Fused kernel: pos-encoding add + nlayers encoder layers + output projection
# ----------------------------------------------------------------------------
def fused_transformer_kernel(x_ref, pe_ref, mask_ref,
                             wqkv_ref, wo_ref, vec_ref, w1_ref, w2_ref,
                             wout_ref, bout_ref,
                             o_ref, x_sc, qkv_sc, ctx_sc, *, nhead, eps):
    l = pl.program_id(1)
    nlayers = pl.num_programs(1)

    Bt, S, E = x_sc.shape
    H = nhead
    Dh = E // H
    nhid = w1_ref.shape[-1]
    npad = o_ref.shape[-1]

    # --- first layer step: add positional encoding (sqrt(E) pre-folded) -----
    @pl.when(l == 0)
    def _():
        x_sc[...] = x_ref[...].astype(jnp.float32) + pe_ref[...]

    x = x_sc[...]                                   # (Bt, S, E) float32

    # packed per-layer vectors: [bqkv, bo, g1, be1, b1, b2, g2, be2]
    vec = vec_ref[0]                                # (8, Wv) float32
    bqkv = vec[0:1, :3 * E]
    bo = vec[1:2, :E]
    g1 = vec[2:3, :E]
    be1 = vec[3:4, :E]
    b1 = vec[4:5, :nhid]
    b2 = vec[5:6, :E]
    g2 = vec[6:7, :E]
    be2 = vec[7:8, :E]

    # --- fused QKV projection: one lane-dense (Bt*S, E) @ (E, 3E) matmul ----
    x2 = x.reshape(Bt * S, E).astype(jnp.bfloat16)
    qkv = jnp.dot(x2, wqkv_ref[0], preferred_element_type=jnp.float32) + bqkv
    qkv_sc[...] = qkv.reshape(Bt, S, 3 * E)         # stage for per-head slices

    mask = mask_ref[...][None]                      # (1, S, S) additive mask

    # --- per-head attention via cheap lane-window slices of the fused qkv ---
    # (1/sqrt(Dh) is folded into the Q weights/bias at init.)
    for h in range(H):
        q_h = qkv_sc[:, :, h * Dh:(h + 1) * Dh].astype(jnp.bfloat16)
        k_h = qkv_sc[:, :, E + h * Dh:E + (h + 1) * Dh].astype(jnp.bfloat16)
        v_h = qkv_sc[:, :, 2 * E + h * Dh:2 * E + (h + 1) * Dh].astype(jnp.bfloat16)
        s_h = jnp.einsum('bqd,bkd->bqk', q_h, k_h,
                         preferred_element_type=jnp.float32)
        s_h = s_h + mask
        m_h = jnp.max(s_h, axis=-1, keepdims=True)
        p_h = jnp.exp(s_h - m_h)                    # f32 scores
        l_h = jnp.sum(p_h, axis=-1, keepdims=True)
        # NOTE: a fully-masked row (all -inf) would yield NaN; safe with the
        # strictly-causal mask used here (diagonal is 0).
        ctx_h = jnp.einsum('bqk,bkd->bqd', p_h.astype(jnp.bfloat16), v_h,
                           preferred_element_type=jnp.float32)
        ctx_h = ctx_h * pl.reciprocal(l_h, approx=True)   # 1/l on small ctx
        ctx_sc[:, :, h * Dh:(h + 1) * Dh] = ctx_h   # assemble (Bt, S, H*Dh)

    # --- fused output projection: one full-K (Bt*S, E) @ (E, E) matmul ------
    ctx = ctx_sc[...].reshape(Bt * S, E).astype(jnp.bfloat16)
    attn = jnp.dot(ctx, wo_ref[0], preferred_element_type=jnp.float32) + bo
    attn = attn.reshape(Bt, S, E)

    # --- residual + LayerNorm 1 (post-norm, PyTorch default) ----------------
    y = x + attn
    mu = jnp.mean(y, axis=-1, keepdims=True)
    var = jnp.mean((y - mu) ** 2, axis=-1, keepdims=True)
    y = (y - mu) * jax.lax.rsqrt(var + eps) * g1 + be1

    # --- feed-forward (ReLU) -------------------------------------------------
    y2 = y.reshape(Bt * S, E).astype(jnp.bfloat16)
    h1 = jnp.dot(y2, w1_ref[0], preferred_element_type=jnp.float32) + b1
    h1 = jnp.maximum(h1, 0.0)
    ff = jnp.dot(h1.astype(jnp.bfloat16), w2_ref[0],
                 preferred_element_type=jnp.float32) + b2

    # --- residual + LayerNorm 2 ----------------------------------------------
    z = y + ff.reshape(Bt, S, E)
    mu2 = jnp.mean(z, axis=-1, keepdims=True)
    var2 = jnp.mean((z - mu2) ** 2, axis=-1, keepdims=True)
    z = (z - mu2) * jax.lax.rsqrt(var2 + eps) * g2 + be2

    x_sc[...] = z                                   # carry activation to l+1

    # --- last layer step: fused output projection (lane-padded vocab) -------
    @pl.when(l == nlayers - 1)
    def _():
        logits = jnp.dot(z.reshape(Bt * S, E).astype(jnp.bfloat16),
                         wout_ref[...],
                         preferred_element_type=jnp.float32) + bout_ref[...]
        o_ref[...] = logits.reshape(Bt, S, npad)


# ----------------------------------------------------------------------------
# Parameters
# ----------------------------------------------------------------------------
def _round_up(x, m):
    return ((x + m - 1) // m) * m


def make_positional_encoding(max_len, em_dim):
    pos = jnp.arange(max_len, dtype=jnp.float32)[:, None]
    div = jnp.exp(jnp.arange(0, em_dim, 2, dtype=jnp.float32)
                  * (-math.log(10000.0) / em_dim))
    pe = jnp.zeros((max_len, em_dim), jnp.float32)
    pe = pe.at[:, 0::2].set(jnp.sin(pos * div))
    pe = pe.at[:, 1::2].set(jnp.cos(pos * div))
    return pe


def init_params(key, ntoken, em_dim, nhead, nhid, nlayers, max_len):
    E, H = em_dim, nhead
    assert E % H == 0
    Dh = E // H
    npad = _round_up(ntoken, 128)
    Wv = _round_up(max(3 * E, nhid), 128)
    inv_sqrt_d = 1.0 / math.sqrt(Dh)
    scale = 0.02
    keys = jax.random.split(key, 2 + nlayers)

    emb = scale * jax.random.normal(keys[0], (ntoken, E), jnp.float32)
    emb = emb.at[0].set(0.0)                       # padding_idx=0 -> zero row
    emb = emb * math.sqrt(E)                       # fold sqrt(em_dim) scale

    wqkv_l, wo_l, w1_l, w2_l, vec_l = [], [], [], [], []
    for layer in range(nlayers):
        k0, k1, k2, k3 = jax.random.split(keys[2 + layer], 4)
        wqkv = scale * jax.random.normal(k0, (E, 3 * E), jnp.float32)  # W_in^T
        wqkv = wqkv.at[:, :E].multiply(inv_sqrt_d)  # fold 1/sqrt(Dh) into Q
        bqkv = jnp.zeros((3 * E,), jnp.float32)
        bqkv = bqkv.at[:E].multiply(inv_sqrt_d)
        wo = scale * jax.random.normal(k1, (E, E), jnp.float32)        # W_o^T
        w1 = scale * jax.random.normal(k2, (E, nhid), jnp.float32)
        w2 = scale * jax.random.normal(k3, (nhid, E), jnp.float32)

        vec = jnp.zeros((8, Wv), jnp.float32)
        vec = vec.at[0, :3 * E].set(bqkv)                 # bqkv
        vec = vec.at[1, :E].set(jnp.zeros((E,)))          # bo
        vec = vec.at[2, :E].set(jnp.ones((E,)))           # g1
        vec = vec.at[3, :E].set(jnp.zeros((E,)))          # be1
        vec = vec.at[4, :nhid].set(jnp.zeros((nhid,)))    # b1
        vec = vec.at[5, :E].set(jnp.zeros((E,)))          # b2
        vec = vec.at[6, :E].set(jnp.ones((E,)))           # g2
        vec = vec.at[7, :E].set(jnp.zeros((E,)))          # be2

        wqkv_l.append(wqkv.astype(jnp.bfloat16))
        wo_l.append(wo.astype(jnp.bfloat16))
        w1_l.append(w1.astype(jnp.bfloat16))
        w2_l.append(w2.astype(jnp.bfloat16))
        vec_l.append(vec)

    w_out = scale * jax.random.normal(keys[1], (E, ntoken), jnp.float32)
    w_out_pad = jnp.zeros((E, npad), jnp.float32).at[:, :ntoken].set(w_out)
    b_out_pad = jnp.zeros((1, npad), jnp.float32)

    return dict(
        ntoken=ntoken,
        embedding=emb,
        pe=make_positional_encoding(max_len, E),
        wqkv=jnp.stack(wqkv_l), wo=jnp.stack(wo_l),
        w1=jnp.stack(w1_l), w2=jnp.stack(w2_l),
        vec=jnp.stack(vec_l),
        w_out=w_out_pad.astype(jnp.bfloat16), b_out=b_out_pad)


def subsequent_mask(size):
    # 0 on/below the diagonal, -inf above (additive causal mask), like the
    # PyTorch module's subsequent_mask().
    tri = jnp.tril(jnp.ones((size, size), jnp.float32))
    return jnp.where(tri > 0, 0.0, -jnp.inf).astype(jnp.float32)


def pick_batch_tile(B, max_tile=8):
    # Amortize per-layer weight DMA over Bt sequences, but keep >= 2 steps on
    # the parallel (batch) grid axis when possible so both v7x TCs get work.
    upper = max(1, min(max_tile, B // 2)) if B >= 2 else 1
    for bt in range(upper, 0, -1):
        if B % bt == 0:
            return bt
    return 1


# ----------------------------------------------------------------------------
# Forward: single fused pallas_call
# ----------------------------------------------------------------------------
def transformer_encoder_forward(src, src_mask, params, nhead, batch_tile=None):
    B, S = src.shape
    # TODO(synk): embedding gather kept in the wrapper (no clean tiled form).
    emb = jnp.take(params["embedding"], src, axis=0).astype(jnp.bfloat16)
    pe = params["pe"][:S]                                 # (S, E) f32
    E = params["embedding"].shape[-1]
    L = params["wqkv"].shape[0]
    nhid = params["w1"].shape[-1]
    npad = params["w_out"].shape[-1]
    Wv = params["vec"].shape[-1]

    Bt = batch_tile if batch_tile is not None else pick_batch_tile(B)
    assert B % Bt == 0

    kernel = functools.partial(fused_transformer_kernel, nhead=nhead, eps=1e-5)

    def batch_spec(shape):
        n = len(shape)
        return pl.BlockSpec(shape, lambda b, l, n=n: (b,) + (0,) * (n - 1))

    def layer_spec(shape):
        n = len(shape)
        return pl.BlockSpec(shape, lambda b, l, n=n: (l,) + (0,) * (n - 1))

    def const_spec(shape):
        n = len(shape)
        return pl.BlockSpec(shape, lambda b, l, n=n: (0,) * n)

    out_pad = pl.pallas_call(
        kernel,
        out_shape=jax.ShapeDtypeStruct((B, S, npad), jnp.float32),
        grid=(B // Bt, L),
        in_specs=[
            batch_spec((Bt, S, E)),              # embedded tokens (bf16)
            const_spec((S, E)),                  # positional encoding
            const_spec((S, S)),                  # additive attention mask
            layer_spec((1, E, 3 * E)),           # fused QKV weight (bf16)
            layer_spec((1, E, E)),               # attn out-proj weight (bf16)
            layer_spec((1, 8, Wv)),              # packed per-layer vectors
            layer_spec((1, E, nhid)),            # FFN W1 (bf16)
            layer_spec((1, nhid, E)),            # FFN W2 (bf16)
            const_spec((E, npad)),               # output weight (lane-padded)
            const_spec((1, npad)),               # output bias  (lane-padded)
        ],
        out_specs=batch_spec((Bt, S, npad)),
        scratch_shapes=[pltpu.VMEM((Bt, S, E), jnp.float32),      # x carry
                        pltpu.VMEM((Bt, S, 3 * E), jnp.float32),  # qkv staging
                        pltpu.VMEM((Bt, S, E), jnp.float32)],     # ctx assembly
        compiler_params=pltpu.CompilerParams(
            dimension_semantics=("parallel", "arbitrary"),
            # Fits v7x's 64 MiB physical VMEM with headroom; well above the
            # 16 MiB v5e scoped default.  Re-budget at vocab-scale sizes.
            vmem_limit_bytes=48 * 1024 * 1024),
    )(emb, pe, src_mask.astype(jnp.float32),
      params["wqkv"], params["wo"], params["vec"],
      params["w1"], params["w2"],
      params["w_out"], params["b_out"])

    return out_pad[..., :params["ntoken"]]


# ----------------------------------------------------------------------------
if __name__ == "__main__":
    ntoken, em_dim, nhead, nhid, nlayers = 50, 32, 4, 64, 2
    max_len = 256
    B, S = 2, 8

    key = jax.random.PRNGKey(0)
    kp, ks = jax.random.split(key)
    params = init_params(kp, ntoken, em_dim, nhead, nhid, nlayers, max_len)

    src = jax.random.randint(ks, (B, S), 1, ntoken, dtype=jnp.int32)
    src_mask = subsequent_mask(S)

    out = transformer_encoder_forward(src, src_mask, params, nhead)
    out = jax.block_until_ready(out)

    assert out.shape == (B, S, ntoken), out.shape
    assert bool(jnp.all(jnp.isfinite(out)))
    print("KERNEL_OK")
</pallas_src>

<mosaic_0001>
module attributes {stable_mosaic.version = 11 : i64} {
  func.func @fused_transformer_kernel(%arg0: i32, %arg1: i32, %arg2: memref<1x8x32xbf16, #tpu.memory_space<vmem>>, %arg3: memref<8x32xf32, #tpu.memory_space<vmem>>, %arg4: memref<8x8xf32, #tpu.memory_space<vmem>>, %arg5: memref<1x32x96xbf16, #tpu.memory_space<vmem>>, %arg6: memref<1x32x32xbf16, #tpu.memory_space<vmem>>, %arg7: memref<1x8x128xf32, #tpu.memory_space<vmem>>, %arg8: memref<1x32x64xbf16, #tpu.memory_space<vmem>>, %arg9: memref<1x64x32xbf16, #tpu.memory_space<vmem>>, %arg10: memref<32x128xbf16, #tpu.memory_space<vmem>>, %arg11: memref<1x128xf32, #tpu.memory_space<vmem>>, %arg12: memref<1x8x128xf32, #tpu.memory_space<vmem>>, %arg13: memref<1x8x32xf32, #tpu.memory_space<vmem>>, %arg14: memref<1x8x96xf32, #tpu.memory_space<vmem>>, %arg15: memref<1x8x32xf32, #tpu.memory_space<vmem>>) attributes {dimension_semantics = [#tpu.dimension_semantics<parallel>, #tpu.dimension_semantics<arbitrary>], iteration_bounds = array<i64: 2, 2>, scalar_prefetch = 0 : i64, scratch_operands = 3 : i64, tpu.core_type = #tpu.core_type<tc>, window_params = [{transform_indices = @transform_0, window_bounds = array<i64: 1, 8, 32>}, {pipeline_mode = #tpu.pipeline_mode<synchronous>, transform_indices = @transform_1, window_bounds = array<i64: 8, 32>}, {pipeline_mode = #tpu.pipeline_mode<synchronous>, transform_indices = @transform_2, window_bounds = array<i64: 8, 8>}, {transform_indices = @transform_3, window_bounds = array<i64: 1, 32, 96>}, {transform_indices = @transform_4, window_bounds = array<i64: 1, 32, 32>}, {transform_indices = @transform_5, window_bounds = array<i64: 1, 8, 128>}, {transform_indices = @transform_6, window_bounds = array<i64: 1, 32, 64>}, {transform_indices = @transform_7, window_bounds = array<i64: 1, 64, 32>}, {pipeline_mode = #tpu.pipeline_mode<synchronous>, transform_indices = @transform_8, window_bounds = array<i64: 32, 128>}, {pipeline_mode = #tpu.pipeline_mode<synchronous>, transform_indices = @transform_9, window_bounds = array<i64: 1, 128>}, {transform_indices = @transform_10, window_bounds = array<i64: 1, 8, 128>}]} {
    %c0_i32 = arith.constant 0 : i32
    %0 = arith.cmpi eq, %arg1, %c0_i32 : i32
    %1 = arith.extui %0 : i1 to i32
    %c0_i32_0 = arith.constant 0 : i32
    %2 = arith.cmpi ne, %1, %c0_i32_0 : i32
    scf.if %2 {
      %c0_97 = arith.constant 0 : index
      %c0_98 = arith.constant 0 : index
      %c0_99 = arith.constant 0 : index
      %188 = vector.load %arg2[%c0_97, %c0_98, %c0_99] : memref<1x8x32xbf16, #tpu.memory_space<vmem>>, vector<1x8x32xbf16>
      %189 = arith.extf %188 : vector<1x8x32xbf16> to vector<1x8x32xf32>
      %c0_100 = arith.constant 0 : index
      %c0_101 = arith.constant 0 : index
      %190 = vector.load %arg3[%c0_100, %c0_101] : memref<8x32xf32, #tpu.memory_space<vmem>>, vector<8x32xf32>
      %191 = vector.shape_cast %190 : vector<8x32xf32> to vector<1x8x32xf32>
      %192 = arith.addf %189, %191 : vector<1x8x32xf32>
      %c0_102 = arith.constant 0 : index
      %c0_103 = arith.constant 0 : index
      %c0_104 = arith.constant 0 : index
      %193 = vector.load %arg13[%c0_102, %c0_103, %c0_104] : memref<1x8x32xf32, #tpu.memory_space<vmem>>, vector<1x8x32xf32>
      tpu.vector_store %arg13[%c0_102, %c0_103, %c0_104], %192 {strides = array<i32>} : memref<1x8x32xf32, #tpu.memory_space<vmem>>, vector<1x8x32xf32>,
    } else {
    }
    %c0 = arith.constant 0 : index
    %c0_1 = arith.constant 0 : index
    %c0_2 = arith.constant 0 : index
    %3 = vector.load %arg13[%c0, %c0_1, %c0_2] : memref<1x8x32xf32, #tpu.memory_space<vmem>>, vector<1x8x32xf32>
    %c0_3 = arith.constant 0 : index
    %c0_4 = arith.constant 0 : index
    %c0_5 = arith.constant 0 : index
    %4 = vector.load %arg7[%c0_3, %c0_4, %c0_5] : memref<1x8x128xf32, #tpu.memory_space<vmem>>, vector<1x8x128xf32>
    %5 = vector.shape_cast %4 : vector<1x8x128xf32> to vector<8x128xf32>
    %6 = vector.extract_strided_slice %5 {offsets = [0, 0], sizes = [1, 96], strides = [1, 1]} : vector<8x128xf32> to vector<1x96xf32>
    %7 = vector.extract_strided_slice %5 {offsets = [1, 0], sizes = [1, 32], strides = [1, 1]} : vector<8x128xf32> to vector<1x32xf32>
    %8 = vector.extract_strided_slice %5 {offsets = [2, 0], sizes = [1, 32], strides = [1, 1]} : vector<8x128xf32> to vector<1x32xf32>
    %9 = vector.extract_strided_slice %5 {offsets = [3, 0], sizes = [1, 32], strides = [1, 1]} : vector<8x128xf32> to vector<1x32xf32>
    %10 = vector.extract_strided_slice %5 {offsets = [4, 0], sizes = [1, 64], strides = [1, 1]} : vector<8x128xf32> to vector<1x64xf32>
    %11 = vector.extract_strided_slice %5 {offsets = [5, 0], sizes = [1, 32], strides = [1, 1]} : vector<8x128xf32> to vector<1x32xf32>
    %12 = vector.extract_strided_slice %5 {offsets = [6, 0], sizes = [1, 32], strides = [1, 1]} : vector<8x128xf32> to vector<1x32xf32>
    %13 = vector.extract_strided_slice %5 {offsets = [7, 0], sizes = [1, 32], strides = [1, 1]} : vector<8x128xf32> to vector<1x32xf32>
    %14 = vector.shape_cast %3 : vector<1x8x32xf32> to vector<8x32xf32>
    %15 = arith.truncf %14 : vector<8x32xf32> to vector<8x32xbf16>
    %c0_6 = arith.constant 0 : index
    %c0_7 = arith.constant 0 : index
    %c0_8 = arith.constant 0 : index
    %16 = vector.load %arg5[%c0_6, %c0_7, %c0_8] : memref<1x32x96xbf16, #tpu.memory_space<vmem>>, vector<1x32x96xbf16>
    %17 = vector.shape_cast %16 : vector<1x32x96xbf16> to vector<32x96xbf16>
    %cst = arith.constant dense<0.000000e+00> : vector<8x96xf32>
    %18 = tpu.matmul %15, %17, %cst {dimension_numbers = #tpu.dot_dimension_numbers<[1], [0], [0], [1], [0, 0, 1, 1], [], []>} : vector<8x32xbf16>, vector<32x96xbf16>, vector<8x96xf32> -> vector<8x96xf32>
    %19 = vector.broadcast %6 : vector<1x96xf32> to vector<8x96xf32>
    %20 = arith.addf %18, %19 : vector<8x96xf32>
    %21 = vector.shape_cast %20 : vector<8x96xf32> to vector<1x8x96xf32>
    %c0_9 = arith.constant 0 : index
    %c0_10 = arith.constant 0 : index
    %c0_11 = arith.constant 0 : index
    %22 = vector.load %arg14[%c0_9, %c0_10, %c0_11] : memref<1x8x96xf32, #tpu.memory_space<vmem>>, vector<1x8x96xf32>
    tpu.vector_store %arg14[%c0_9, %c0_10, %c0_11], %21 {strides = array<i32>} : memref<1x8x96xf32, #tpu.memory_space<vmem>>, vector<1x8x96xf32>,
    %c0_12 = arith.constant 0 : index
    %c0_13 = arith.constant 0 : index
    %23 = vector.load %arg4[%c0_12, %c0_13] : memref<8x8xf32, #tpu.memory_space<vmem>>, vector<8x8xf32>
    %24 = vector.shape_cast %23 : vector<8x8xf32> to vector<1x8x8xf32>
    %c0_14 = arith.constant 0 : index
    %c0_15 = arith.constant 0 : index
    %c0_16 = arith.constant 0 : index
    %25 = vector.load %arg14[%c0_14, %c0_15, %c0_16] : memref<1x8x96xf32, #tpu.memory_space<vmem>>, vector<1x8x8xf32>
    %26 = arith.truncf %25 : vector<1x8x8xf32> to vector<1x8x8xbf16>
    %c0_17 = arith.constant 0 : index
    %c0_18 = arith.constant 0 : index
    %c32 = arith.constant 32 : index
    %27 = vector.load %arg14[%c0_17, %c0_18, %c32] : memref<1x8x96xf32, #tpu.memory_space<vmem>>, vector<1x8x8xf32>
    %28 = arith.truncf %27 : vector<1x8x8xf32> to vector<1x8x8xbf16>
    %c0_19 = arith.constant 0 : index
    %c0_20 = arith.constant 0 : index
    %c64 = arith.constant 64 : index
    %29 = vector.load %arg14[%c0_19, %c0_20, %c64] : memref<1x8x96xf32, #tpu.memory_space<vmem>>, vector<1x8x8xf32>
    %30 = arith.truncf %29 : vector<1x8x8xf32> to vector<1x8x8xbf16>
    "tpu.trace_start"() <{level = 10 : i32, message = "bqd,bkd->bqk"}> : () -> ()
    %cst_21 = arith.constant dense<0.000000e+00> : vector<1x8x8xf32>
    %31 = tpu.matmul %26, %28, %cst_21 {dimension_numbers = #tpu.dot_dimension_numbers<[2], [2], [1], [1], [0, 0, 0, 1, 1, 1], [0], [0]>} : vector<1x8x8xbf16>, vector<1x8x8xbf16>, vector<1x8x8xf32> -> vector<1x8x8xf32>
    "tpu.trace_stop"() : () -> ()
    %32 = arith.addf %31, %24 : vector<1x8x8xf32>
    %cst_22 = arith.constant dense<0xFF800000> : vector<1x8xf32>
    %33 = vector.multi_reduction <maximumf>, %32, %cst_22 [2] : vector<1x8x8xf32> to vector<1x8xf32>
    %34 = vector.shape_cast %33 : vector<1x8xf32> to vector<1x8x1xf32>
    %35 = vector.broadcast %34 : vector<1x8x1xf32> to vector<1x8x8xf32>
    %36 = arith.subf %32, %35 : vector<1x8x8xf32>
    %37 = math.exp %36 : vector<1x8x8xf32>
    %cst_23 = arith.constant dense<0.000000e+00> : vector<1x8xf32>
    %38 = vector.multi_reduction <add>, %37, %cst_23 [2] : vector<1x8x8xf32> to vector<1x8xf32>
    %39 = vector.shape_cast %38 : vector<1x8xf32> to vector<1x8x1xf32>
    %40 = arith.truncf %37 : vector<1x8x8xf32> to vector<1x8x8xbf16>
    "tpu.trace_start"() <{level = 10 : i32, message = "bqk,bkd->bqd"}> : () -> ()
    %cst_24 = arith.constant dense<0.000000e+00> : vector<1x8x8xf32>
    %41 = tpu.matmul %40, %30, %cst_24 {dimension_numbers = #tpu.dot_dimension_numbers<[2], [1], [1], [2], [0, 0, 0, 1, 1, 2], [0], [0]>} : vector<1x8x8xbf16>, vector<1x8x8xbf16>, vector<1x8x8xf32> -> vector<1x8x8xf32>
    "tpu.trace_stop"() : () -> ()
    %42 = tpu.reciprocal %39 {approx = true} : vector<1x8x1xf32> -> vector<1x8x1xf32>
    %43 = vector.broadcast %42 : vector<1x8x1xf32> to vector<1x8x8xf32>
    %44 = arith.mulf %41, %43 : vector<1x8x8xf32>
    %c0_25 = arith.constant 0 : index
    %c0_26 = arith.constant 0 : index
    %c0_27 = arith.constant 0 : index
    %45 = vector.load %arg15[%c0_25, %c0_26, %c0_27] : memref<1x8x32xf32, #tpu.memory_space<vmem>>, vector<1x8x8xf32>
    tpu.vector_store %arg15[%c0_25, %c0_26, %c0_27], %44 {strides = array<i32>} : memref<1x8x32xf32, #tpu.memory_space<vmem>>, vector<1x8x8xf32>,
    %c0_28 = arith.constant 0 : index
    %c0_29 = arith.constant 0 : index
    %c8 = arith.constant 8 : index
    %46 = vector.load %arg14[%c0_28, %c0_29, %c8] : memref<1x8x96xf32, #tpu.memory_space<vmem>>, vector<1x8x8xf32>
    %47 = arith.truncf %46 : vector<1x8x8xf32> to vector<1x8x8xbf16>
    %c0_30 = arith.constant 0 : index
    %c0_31 = arith.constant 0 : index
    %c40 = arith.constant 40 : index
    %48 = vector.load %arg14[%c0_30, %c0_31, %c40] : memref<1x8x96xf32, #tpu.memory_space<vmem>>, vector<1x8x8xf32>
    %49 = arith.truncf %48 : vector<1x8x8xf32> to vector<1x8x8xbf16>
    %c0_32 = arith.constant 0 : index
    %c0_33 = arith.constant 0 : index
    %c72 = arith.constant 72 : index
    %50 = vector.load %arg14[%c0_32, %c0_33, %c72] : memref<1x8x96xf32, #tpu.memory_space<vmem>>, vector<1x8x8xf32>
    %51 = arith.truncf %50 : vector<1x8x8xf32> to vector<1x8x8xbf16>
    "tpu.trace_start"() <{level = 10 : i32, message = "bqd,bkd->bqk"}> : () -> ()
    %cst_34 = arith.constant dense<0.000000e+00> : vector<1x8x8xf32>
    %52 = tpu.matmul %47, %49, %cst_34 {dimension_numbers = #tpu.dot_dimension_numbers<[2], [2], [1], [1], [0, 0, 0, 1, 1, 1], [0], [0]>} : vector<1x8x8xbf16>, vector<1x8x8xbf16>, vector<1x8x8xf32> -> vector<1x8x8xf32>
    "tpu.trace_stop"() : () -> ()
    %53 = arith.addf %52, %24 : vector<1x8x8xf32>
    %cst_35 = arith.constant dense<0xFF800000> : vector<1x8xf32>
    %54 = vector.multi_reduction <maximumf>, %53, %cst_35 [2] : vector<1x8x8xf32> to vector<1x8xf32>
    %55 = vector.shape_cast %54 : vector<1x8xf32> to vector<1x8x1xf32>
    %56 = vector.broadcast %55 : vector<1x8x1xf32> to vector<1x8x8xf32>
    %57 = arith.subf %53, %56 : vector<1x8x8xf32>
    %58 = math.exp %57 : vector<1x8x8xf32>
    %cst_36 = arith.constant dense<0.000000e+00> : vector<1x8xf32>
    %59 = vector.multi_reduction <add>, %58, %cst_36 [2] : vector<1x8x8xf32> to vector<1x8xf32>
    %60 = vector.shape_cast %59 : vector<1x8xf32> to vector<1x8x1xf32>
    %61 = arith.truncf %58 : vector<1x8x8xf32> to vector<1x8x8xbf16>
    "tpu.trace_start"() <{level = 10 : i32, message = "bqk,bkd->bqd"}> : () -> ()
    %cst_37 = arith.constant dense<0.000000e+00> : vector<1x8x8xf32>
    %62 = tpu.matmul %61, %51, %cst_37 {dimension_numbers = #tpu.dot_dimension_numbers<[2], [1], [1], [2], [0, 0, 0, 1, 1, 2], [0], [0]>} : vector<1x8x8xbf16>, vector<1x8x8xbf16>, vector<1x8x8xf32> -> vector<1x8x8xf32>
    "tpu.trace_stop"() : () -> ()
    %63 = tpu.reciprocal %60 {approx = true} : vector<1x8x1xf32> -> vector<1x8x1xf32>
    %64 = vector.broadcast %63 : vector<1x8x1xf32> to vector<1x8x8xf32>
    %65 = arith.mulf %62, %64 : vector<1x8x8xf32>
    %c0_38 = arith.constant 0 : index
    %c0_39 = arith.constant 0 : index
    %c8_40 = arith.constant 8 : index
    %66 = vector.load %arg15[%c0_38, %c0_39, %c8_40] : memref<1x8x32xf32, #tpu.memory_space<vmem>>, vector<1x8x8xf32>
    tpu.vector_store %arg15[%c0_38, %c0_39, %c8_40], %65 {strides = array<i32>} : memref<1x8x32xf32, #tpu.memory_space<vmem>>, vector<1x8x8xf32>,
    %c0_41 = arith.constant 0 : index
    %c0_42 = arith.constant 0 : index
    %c16 = arith.constant 16 : index
    %67 = vector.load %arg14[%c0_41, %c0_42, %c16] : memref<1x8x96xf32, #tpu.memory_space<vmem>>, vector<1x8x8xf32>
    %68 = arith.truncf %67 : vector<1x8x8xf32> to vector<1x8x8xbf16>
    %c0_43 = arith.constant 0 : index
    %c0_44 = arith.constant 0 : index
    %c48 = arith.constant 48 : index
    %69 = vector.load %arg14[%c0_43, %c0_44, %c48] : memref<1x8x96xf32, #tpu.memory_space<vmem>>, vector<1x8x8xf32>
    %70 = arith.truncf %69 : vector<1x8x8xf32> to vector<1x8x8xbf16>
    %c0_45 = arith.constant 0 : index
    %c0_46 = arith.constant 0 : index
    %c80 = arith.constant 80 : index
    %71 = vector.load %arg14[%c0_45, %c0_46, %c80] : memref<1x8x96xf32, #tpu.memory_space<vmem>>, vector<1x8x8xf32>
    %72 = arith.truncf %71 : vector<1x8x8xf32> to vector<1x8x8xbf16>
    "tpu.trace_start"() <{level = 10 : i32, message = "bqd,bkd->bqk"}> : () -> ()
    %cst_47 = arith.constant dense<0.000000e+00> : vector<1x8x8xf32>
    %73 = tpu.matmul %68, %70, %cst_47 {dimension_numbers = #tpu.dot_dimension_numbers<[2], [2], [1], [1], [0, 0, 0, 1, 1, 1], [0], [0]>} : vector<1x8x8xbf16>, vector<1x8x8xbf16>, vector<1x8x8xf32> -> vector<1x8x8xf32>
    "tpu.trace_stop"() : () -> ()
    %74 = arith.addf %73, %24 : vector<1x8x8xf32>
    %cst_48 = arith.constant dense<0xFF800000> : vector<1x8xf32>
    %75 = vector.multi_reduction <maximumf>, %74, %cst_48 [2] : vector<1x8x8xf32> to vector<1x8xf32>
    %76 = vector.shape_cast %75 : vector<1x8xf32> to vector<1x8x1xf32>
    %77 = vector.broadcast %76 : vector<1x8x1xf32> to vector<1x8x8xf32>
    %78 = arith.subf %74, %77 : vector<1x8x8xf32>
    %79 = math.exp %78 : vector<1x8x8xf32>
    %cst_49 = arith.constant dense<0.000000e+00> : vector<1x8xf32>
    %80 = vector.multi_reduction <add>, %79, %cst_49 [2] : vector<1x8x8xf32> to vector<1x8xf32>
    %81 = vector.shape_cast %80 : vector<1x8xf32> to vector<1x8x1xf32>
    %82 = arith.truncf %79 : vector<1x8x8xf32> to vector<1x8x8xbf16>
    "tpu.trace_start"() <{level = 10 : i32, message = "bqk,bkd->bqd"}> : () -> ()
    %cst_50 = arith.constant dense<0.000000e+00> : vector<1x8x8xf32>
    %83 = tpu.matmul %82, %72, %cst_50 {dimension_numbers = #tpu.dot_dimension_numbers<[2], [1], [1], [2], [0, 0, 0, 1, 1, 2], [0], [0]>} : vector<1x8x8xbf16>, vector<1x8x8xbf16>, vector<1x8x8xf32> -> vector<1x8x8xf32>
    "tpu.trace_stop"() : () -> ()
    %84 = tpu.reciprocal %81 {approx = true} : vector<1x8x1xf32> -> vector<1x8x1xf32>
    %85 = vector.broadcast %84 : vector<1x8x1xf32> to vector<1x8x8xf32>
    %86 = arith.mulf %83, %85 : vector<1x8x8xf32>
    %c0_51 = arith.constant 0 : index
    %c0_52 = arith.constant 0 : index
    %c16_53 = arith.constant 16 : index
    %87 = vector.load %arg15[%c0_51, %c0_52, %c16_53] : memref<1x8x32xf32, #tpu.memory_space<vmem>>, vector<1x8x8xf32>
    tpu.vector_store %arg15[%c0_51, %c0_52, %c16_53], %86 {strides = array<i32>} : memref<1x8x32xf32, #tpu.memory_space<vmem>>, vector<1x8x8xf32>,
    %c0_54 = arith.constant 0 : index
    %c0_55 = arith.constant 0 : index
    %c24 = arith.constant 24 : index
    %88 = vector.load %arg14[%c0_54, %c0_55, %c24] : memref<1x8x96xf32, #tpu.memory_space<vmem>>, vector<1x8x8xf32>
    %89 = arith.truncf %88 : vector<1x8x8xf32> to vector<1x8x8xbf16>
    %c0_56 = arith.constant 0 : index
    %c0_57 = arith.constant 0 : index
    %c56 = arith.constant 56 : index
    %90 = vector.load %arg14[%c0_56, %c0_57, %c56] : memref<1x8x96xf32, #tpu.memory_space<vmem>>, vector<1x8x8xf32>
    %91 = arith.truncf %90 : vector<1x8x8xf32> to vector<1x8x8xbf16>
    %c0_58 = arith.constant 0 : index
    %c0_59 = arith.constant 0 : index
    %c88 = arith.constant 88 : index
    %92 = vector.load %arg14[%c0_58, %c0_59, %c88] : memref<1x8x96xf32, #tpu.memory_space<vmem>>, vector<1x8x8xf32>
    %93 = arith.truncf %92 : vector<1x8x8xf32> to vector<1x8x8xbf16>
    "tpu.trace_start"() <{level = 10 : i32, message = "bqd,bkd->bqk"}> : () -> ()
    %cst_60 = arith.constant dense<0.000000e+00> : vector<1x8x8xf32>
    %94 = tpu.matmul %89, %91, %cst_60 {dimension_numbers = #tpu.dot_dimension_numbers<[2], [2], [1], [1], [0, 0, 0, 1, 1, 1], [0], [0]>} : vector<1x8x8xbf16>, vector<1x8x8xbf16>, vector<1x8x8xf32> -> vector<1x8x8xf32>
    "tpu.trace_stop"() : () -> ()
    %95 = arith.addf %94, %24 : vector<1x8x8xf32>
    %cst_61 = arith.constant dense<0xFF800000> : vector<1x8xf32>
    %96 = vector.multi_reduction <maximumf>, %95, %cst_61 [2] : vector<1x8x8xf32> to vector<1x8xf32>
    %97 = vector.shape_cast %96 : vector<1x8xf32> to vector<1x8x1xf32>
    %98 = vector.broadcast %97 : vector<1x8x1xf32> to vector<1x8x8xf32>
    %99 = arith.subf %95, %98 : vector<1x8x8xf32>
    %100 = math.exp %99 : vector<1x8x8xf32>
    %cst_62 = arith.constant dense<0.000000e+00> : vector<1x8xf32>
    %101 = vector.multi_reduction <add>, %100, %cst_62 [2] : vector<1x8x8xf32> to vector<1x8xf32>
    %102 = vector.shape_cast %101 : vector<1x8xf32> to vector<1x8x1xf32>
    %103 = arith.truncf %100 : vector<1x8x8xf32> to vector<1x8x8xbf16>
    "tpu.trace_start"() <{level = 10 : i32, message = "bqk,bkd->bqd"}> : () -> ()
    %cst_63 = arith.constant dense<0.000000e+00> : vector<1x8x8xf32>
    %104 = tpu.matmul %103, %93, %cst_63 {dimension_numbers = #tpu.dot_dimension_numbers<[2], [1], [1], [2], [0, 0, 0, 1, 1, 2], [0], [0]>} : vector<1x8x8xbf16>, vector<1x8x8xbf16>, vector<1x8x8xf32> -> vector<1x8x8xf32>
    "tpu.trace_stop"() : () -> ()
    %105 = tpu.reciprocal %102 {approx = true} : vector<1x8x1xf32> -> vector<1x8x1xf32>
    %106 = vector.broadcast %105 : vector<1x8x1xf32> to vector<1x8x8xf32>
    %107 = arith.mulf %104, %106 : vector<1x8x8xf32>
    %c0_64 = arith.constant 0 : index
    %c0_65 = arith.constant 0 : index
    %c24_66 = arith.constant 24 : index
    %108 = vector.load %arg15[%c0_64, %c0_65, %c24_66] : memref<1x8x32xf32, #tpu.memory_space<vmem>>, vector<1x8x8xf32>
    tpu.vector_store %arg15[%c0_64, %c0_65, %c24_66], %107 {strides = array<i32>} : memref<1x8x32xf32, #tpu.memory_space<vmem>>, vector<1x8x8xf32>,
    %c0_67 = arith.constant 0 : index
    %c0_68 = arith.constant 0 : index
    %c0_69 = arith.constant 0 : index
    %109 = vector.load %arg15[%c0_67, %c0_68, %c0_69] : memref<1x8x32xf32, #tpu.memory_space<vmem>>, vector<1x8x32xf32>
    %110 = vector.shape_cast %109 : vector<1x8x32xf32> to vector<8x32xf32>
    %111 = arith.truncf %110 : vector<8x32xf32> to vector<8x32xbf16>
    %c0_70 = arith.constant 0 : index
    %c0_71 = arith.constant 0 : index
    %c0_72 = arith.constant 0 : index
    %112 = vector.load %arg6[%c0_70, %c0_71, %c0_72] : memref<1x32x32xbf16, #tpu.memory_space<vmem>>, vector<1x32x32xbf16>
    %113 = vector.shape_cast %112 : vector<1x32x32xbf16> to vector<32x32xbf16>
    %cst_73 = arith.constant dense<0.000000e+00> : vector<8x32xf32>
    %114 = tpu.matmul %111, %113, %cst_73 {dimension_numbers = #tpu.dot_dimension_numbers<[1], [0], [0], [1], [0, 0, 1, 1], [], []>} : vector<8x32xbf16>, vector<32x32xbf16>, vector<8x32xf32> -> vector<8x32xf32>
    %115 = vector.broadcast %7 : vector<1x32xf32> to vector<8x32xf32>
    %116 = arith.addf %114, %115 : vector<8x32xf32>
    %117 = vector.shape_cast %116 : vector<8x32xf32> to vector<1x8x32xf32>
    %118 = arith.addf %3, %117 : vector<1x8x32xf32>
    %cst_74 = arith.constant dense<0.000000e+00> : vector<1x8xf32>
    %119 = vector.multi_reduction <add>, %118, %cst_74 [2] : vector<1x8x32xf32> to vector<1x8xf32>
    %120 = vector.shape_cast %119 : vector<1x8xf32> to vector<1x8x1xf32>
    %cst_75 = arith.constant 3.200000e+01 : f32
    %121 = vector.broadcast %cst_75 : f32 to vector<1x8x1xf32>
    %122 = arith.divf %120, %121 : vector<1x8x1xf32>
    %123 = vector.broadcast %122 : vector<1x8x1xf32> to vector<1x8x32xf32>
    %124 = arith.subf %118, %123 : vector<1x8x32xf32>
    %125 = arith.mulf %124, %124 : vector<1x8x32xf32>
    %cst_76 = arith.constant dense<0.000000e+00> : vector<1x8xf32>
    %126 = vector.multi_reduction <add>, %125, %cst_76 [2] : vector<1x8x32xf32> to vector<1x8xf32>
    %127 = vector.shape_cast %126 : vector<1x8xf32> to vector<1x8x1xf32>
    %cst_77 = arith.constant 3.200000e+01 : f32
    %128 = vector.broadcast %cst_77 : f32 to vector<1x8x1xf32>
    %129 = arith.divf %127, %128 : vector<1x8x1xf32>
    %130 = vector.broadcast %122 : vector<1x8x1xf32> to vector<1x8x32xf32>
    %131 = arith.subf %118, %130 : vector<1x8x32xf32>
    %cst_78 = arith.constant 9.99999974E-6 : f32
    %132 = vector.broadcast %cst_78 : f32 to vector<1x8x1xf32>
    %133 = arith.addf %129, %132 : vector<1x8x1xf32>
    %134 = math.rsqrt %133 : vector<1x8x1xf32>
    %135 = vector.broadcast %134 : vector<1x8x1xf32> to vector<1x8x32xf32>
    %136 = arith.mulf %131, %135 : vector<1x8x32xf32>
    %137 = vector.shape_cast %8 : vector<1x32xf32> to vector<1x1x32xf32>
    %138 = vector.broadcast %137 : vector<1x1x32xf32> to vector<1x8x32xf32>
    %139 = arith.mulf %136, %138 : vector<1x8x32xf32>
    %140 = vector.shape_cast %9 : vector<1x32xf32> to vector<1x1x32xf32>
    %141 = vector.broadcast %140 : vector<1x1x32xf32> to vector<1x8x32xf32>
    %142 = arith.addf %139, %141 : vector<1x8x32xf32>
    %143 = vector.shape_cast %142 : vector<1x8x32xf32> to vector<8x32xf32>
    %144 = arith.truncf %143 : vector<8x32xf32> to vector<8x32xbf16>
    %c0_79 = arith.constant 0 : index
    %c0_80 = arith.constant 0 : index
    %c0_81 = arith.constant 0 : index
    %145 = vector.load %arg8[%c0_79, %c0_80, %c0_81] : memref<1x32x64xbf16, #tpu.memory_space<vmem>>, vector<1x32x64xbf16>
    %146 = vector.shape_cast %145 : vector<1x32x64xbf16> to vector<32x64xbf16>
    %cst_82 = arith.constant dense<0.000000e+00> : vector<8x64xf32>
    %147 = tpu.matmul %144, %146, %cst_82 {dimension_numbers = #tpu.dot_dimension_numbers<[1], [0], [0], [1], [0, 0, 1, 1], [], []>} : vector<8x32xbf16>, vector<32x64xbf16>, vector<8x64xf32> -> vector<8x64xf32>
    %148 = vector.broadcast %10 : vector<1x64xf32> to vector<8x64xf32>
    %149 = arith.addf %147, %148 : vector<8x64xf32>
    %cst_83 = arith.constant 0.000000e+00 : f32
    %150 = vector.broadcast %cst_83 : f32 to vector<8x64xf32>
    %151 = arith.maximumf %149, %150 : vector<8x64xf32>
    %152 = arith.truncf %151 : vector<8x64xf32> to vector<8x64xbf16>
    %c0_84 = arith.constant 0 : index
    %c0_85 = arith.constant 0 : index
    %c0_86 = arith.constant 0 : index
    %153 = vector.load %arg9[%c0_84, %c0_85, %c0_86] : memref<1x64x32xbf16, #tpu.memory_space<vmem>>, vector<1x64x32xbf16>
    %154 = vector.shape_cast %153 : vector<1x64x32xbf16> to vector<64x32xbf16>
    %cst_87 = arith.constant dense<0.000000e+00> : vector<8x32xf32>
    %155 = tpu.matmul %152, %154, %cst_87 {dimension_numbers = #tpu.dot_dimension_numbers<[1], [0], [0], [1], [0, 0, 1, 1], [], []>} : vector<8x64xbf16>, vector<64x32xbf16>, vector<8x32xf32> -> vector<8x32xf32>
    %156 = vector.broadcast %11 : vector<1x32xf32> to vector<8x32xf32>
    %157 = arith.addf %155, %156 : vector<8x32xf32>
    %158 = vector.shape_cast %157 : vector<8x32xf32> to vector<1x8x32xf32>
    %159 = arith.addf %142, %158 : vector<1x8x32xf32>
    %cst_88 = arith.constant dense<0.000000e+00> : vector<1x8xf32>
    %160 = vector.multi_reduction <add>, %159, %cst_88 [2] : vector<1x8x32xf32> to vector<1x8xf32>
    %161 = vector.shape_cast %160 : vector<1x8xf32> to vector<1x8x1xf32>
    %cst_89 = arith.constant 3.200000e+01 : f32
    %162 = vector.broadcast %cst_89 : f32 to vector<1x8x1xf32>
    %163 = arith.divf %161, %162 : vector<1x8x1xf32>
    %164 = vector.broadcast %163 : vector<1x8x1xf32> to vector<1x8x32xf32>
    %165 = arith.subf %159, %164 : vector<1x8x32xf32>
    %166 = arith.mulf %165, %165 : vector<1x8x32xf32>
    %cst_90 = arith.constant dense<0.000000e+00> : vector<1x8xf32>
    %167 = vector.multi_reduction <add>, %166, %cst_90 [2] : vector<1x8x32xf32> to vector<1x8xf32>
    %168 = vector.shape_cast %167 : vector<1x8xf32> to vector<1x8x1xf32>
    %cst_91 = arith.constant 3.200000e+01 : f32
    %169 = vector.broadcast %cst_91 : f32 to vector<1x8x1xf32>
    %170 = arith.divf %168, %169 : vector<1x8x1xf32>
    %171 = vector.broadcast %163 : vector<1x8x1xf32> to vector<1x8x32xf32>
    %172 = arith.subf %159, %171 : vector<1x8x32xf32>
    %cst_92 = arith.constant 9.99999974E-6 : f32
    %173 = vector.broadcast %cst_92 : f32 to vector<1x8x1xf32>
    %174 = arith.addf %170, %173 : vector<1x8x1xf32>
    %175 = math.rsqrt %174 : vector<1x8x1xf32>
    %176 = vector.broadcast %175 : vector<1x8x1xf32> to vector<1x8x32xf32>
    %177 = arith.mulf %172, %176 : vector<1x8x32xf32>
    %178 = vector.shape_cast %12 : vector<1x32xf32> to vector<1x1x32xf32>
    %179 = vector.broadcast %178 : vector<1x1x32xf32> to vector<1x8x32xf32>
    %180 = arith.mulf %177, %179 : vector<1x8x32xf32>
    %181 = vector.shape_cast %13 : vector<1x32xf32> to vector<1x1x32xf32>
    %182 = vector.broadcast %181 : vector<1x1x32xf32> to vector<1x8x32xf32>
    %183 = arith.addf %180, %182 : vector<1x8x32xf32>
    %c0_93 = arith.constant 0 : index
    %c0_94 = arith.constant 0 : index
    %c0_95 = arith.constant 0 : index
    %184 = vector.load %arg13[%c0_93, %c0_94, %c0_95] : memref<1x8x32xf32, #tpu.memory_space<vmem>>, vector<1x8x32xf32>
    tpu.vector_store %arg13[%c0_93, %c0_94, %c0_95], %183 {strides = array<i32>} : memref<1x8x32xf32, #tpu.memory_space<vmem>>, vector<1x8x32xf32>,
    %c1_i32 = arith.constant 1 : i32
    %185 = arith.cmpi eq, %arg1, %c1_i32 : i32
    %186 = arith.extui %185 : i1 to i32
    %c0_i32_96 = arith.constant 0 : i32
    %187 = arith.cmpi ne, %186, %c0_i32_96 : i32
    scf.if %187 {
      %188 = vector.shape_cast %183 : vector<1x8x32xf32> to vector<8x32xf32>
      %189 = arith.truncf %188 : vector<8x32xf32> to vector<8x32xbf16>
      %c0_97 = arith.constant 0 : index
      %c0_98 = arith.constant 0 : index
      %190 = vector.load %arg10[%c0_97, %c0_98] : memref<32x128xbf16, #tpu.memory_space<vmem>>, vector<32x128xbf16>
      %cst_99 = arith.constant dense<0.000000e+00> : vector<8x128xf32>
      %191 = tpu.matmul %189, %190, %cst_99 {dimension_numbers = #tpu.dot_dimension_numbers<[1], [0], [0], [1], [0, 0, 1, 1], [], []>} : vector<8x32xbf16>, vector<32x128xbf16>, vector<8x128xf32> -> vector<8x128xf32>
      %c0_100 = arith.constant 0 : index
      %c0_101 = arith.constant 0 : index
      %192 = vector.load %arg11[%c0_100, %c0_101] : memref<1x128xf32, #tpu.memory_space<vmem>>, vector<1x128xf32>
      %193 = vector.broadcast %192 : vector<1x128xf32> to vector<8x128xf32>
      %194 = arith.addf %191, %193 : vector<8x128xf32>
      %195 = vector.shape_cast %194 : vector<8x128xf32> to vector<1x8x128xf32>
      %c0_102 = arith.constant 0 : index
      %c0_103 = arith.constant 0 : index
      %c0_104 = arith.constant 0 : index
      %196 = vector.load %arg12[%c0_102, %c0_103, %c0_104] : memref<1x8x128xf32, #tpu.memory_space<vmem>>, vector<1x8x128xf32>
      tpu.vector_store %arg12[%c0_102, %c0_103, %c0_104], %195 {strides = array<i32>} : memref<1x8x128xf32, #tpu.memory_space<vmem>>, vector<1x8x128xf32>,
    } else {
    }
    return
  }
  func.func @transform_0(%arg0: i32, %arg1: i32) -> (i32, i32, i32) {
    %c0_i32 = arith.constant 0 : i32
    %c0_i32_0 = arith.constant 0 : i32
    %c0_i32_1 = arith.constant 0 : i32
    return %arg0, %c0_i32, %c0_i32_0 : i32, i32, i32
  }
  func.func @transform_1(%arg0: i32, %arg1: i32) -> (i32, i32) {
    %c0_i32 = arith.constant 0 : i32
    %c0_i32_0 = arith.constant 0 : i32
    %c0_i32_1 = arith.constant 0 : i32
    return %c0_i32, %c0_i32_0 : i32, i32
  }
  func.func @transform_2(%arg0: i32, %arg1: i32) -> (i32, i32) {
    %c0_i32 = arith.constant 0 : i32
    %c0_i32_0 = arith.constant 0 : i32
    %c0_i32_1 = arith.constant 0 : i32
    return %c0_i32, %c0_i32_0 : i32, i32
  }
  func.func @transform_3(%arg0: i32, %arg1: i32) -> (i32, i32, i32) {
    %c0_i32 = arith.constant 0 : i32
    %c0_i32_0 = arith.constant 0 : i32
    %c0_i32_1 = arith.constant 0 : i32
    return %arg1, %c0_i32, %c0_i32_0 : i32, i32, i32
  }
  func.func @transform_4(%arg0: i32, %arg1: i32) -> (i32, i32, i32) {
    %c0_i32 = arith.constant 0 : i32
    %c0_i32_0 = arith.constant 0 : i32
    %c0_i32_1 = arith.constant 0 : i32
    return %arg1, %c0_i32, %c0_i32_0 : i32, i32, i32
  }
  func.func @transform_5(%arg0: i32, %arg1: i32) -> (i32, i32, i32) {
    %c0_i32 = arith.constant 0 : i32
    %c0_i32_0 = arith.constant 0 : i32
    %c0_i32_1 = arith.constant 0 : i32
    return %arg1, %c0_i32, %c0_i32_0 : i32, i32, i32
  }
  func.func @transform_6(%arg0: i32, %arg1: i32) -> (i32, i32, i32) {
    %c0_i32 = arith.constant 0 : i32
    %c0_i32_0 = arith.constant 0 : i32
    %c0_i32_1 = arith.constant 0 : i32
    return %arg1, %c0_i32, %c0_i32_0 : i32, i32, i32
  }
  func.func @transform_7(%arg0: i32, %arg1: i32) -> (i32, i32, i32) {
    %c0_i32 = arith.constant 0 : i32
    %c0_i32_0 = arith.constant 0 : i32
    %c0_i32_1 = arith.constant 0 : i32
    return %arg1, %c0_i32, %c0_i32_0 : i32, i32, i32
  }
  func.func @transform_8(%arg0: i32, %arg1: i32) -> (i32, i32) {
    %c0_i32 = arith.constant 0 : i32
    %c0_i32_0 = arith.constant 0 : i32
    %c0_i32_1 = arith.constant 0 : i32
    return %c0_i32, %c0_i32_0 : i32, i32
  }
  func.func @transform_9(%arg0: i32, %arg1: i32) -> (i32, i32) {
    %c0_i32 = arith.constant 0 : i32
    %c0_i32_0 = arith.constant 0 : i32
    %c0_i32_1 = arith.constant 0 : i32
    return %c0_i32, %c0_i32_0 : i32, i32
  }
  func.func @transform_10(%arg0: i32, %arg1: i32) -> (i32, i32, i32) {
    %c0_i32 = arith.constant 0 : i32
    %c0_i32_0 = arith.constant 0 : i32
    %c0_i32_1 = arith.constant 0 : i32
    return %arg0, %c0_i32, %c0_i32_0 : i32, i32, i32
  }
}

</mosaic_0001>

<bundles_post_ra>
// kernel: tpu_custom_call.1
= control target key start
LH: loop header
LB: loop body
LE: loop exit
PB: predicated region body
PF: predicated region fallthrough
CT: control target
= control target key end

     0   :  { %s2780_s0 = inlined_call_operand.hbm [shape: bf16[2,8,32], index: 0, kind: input, shape index: {}]   ;;  %s2781_s1 = inlined_call_operand.hbm [shape: f32[8,32], index: 1, kind: input, shape index: {}]   ;;  %s2782_s2 = inlined_call_operand.hbm [shape: f32[8,8], index: 2, kind: input, shape index: {}]   ;;  %s2783_s3 = inlined_call_operand.vmem [shape: bf16[2,32,96], index: 3, kind: input, shape index: {}]   ;;  %s2784_s4 = inlined_call_operand.vmem [shape: bf16[2,32,32], index: 4, kind: input, shape index: {}]   ;;  %s2785_s5 = inlined_call_operand.hbm [shape: f32[2,8,128], index: 5, kind: input, shape index: {}]   ;;  %s2786_s6 = inlined_call_operand.vmem [shape: bf16[2,32,64], index: 6, kind: input, shape index: {}]   ;;  %s2787_s7 = inlined_call_operand.vmem [shape: bf16[2,64,32], index: 7, kind: input, shape index: {}]   ;;  %s2788_s8 = inlined_call_operand.hbm [shape: bf16[32,128], index: 8, kind: input, shape index: {}]   ;;  %s2789_s9 = inlined_call_operand.vmem [shape: f32[1,128], index: 9, kind: input, shape index: {}]   ;;  %s2790_s10 = inlined_call_operand.hbm [shape: f32[2,8,128], index: 10, kind: output, shape index: {}]  }
   0x1   :  { %2802 = sst [smem:[#allocation28_spill]] %s2780_s0 }
   0x2   :  { %2803 = sst [smem:[#allocation29_spill]] %s2781_s1 }
   0x3   :  { %2804 = sst [smem:[#allocation30_spill]] %s2782_s2 }
   0x4   :  { %2805 = sst [smem:[#allocation31_spill]] %s2785_s5 }
   0x5   :  { %2806 = sst [smem:[#allocation32_spill]] %s2786_s6 }
   0x6   :  { %2807 = sst [smem:[#allocation33_spill]] %s2787_s7 }
   0x7   :  { %2808 = sst [smem:[#allocation34_spill]] %s2788_s8 }
   0x8   :  { %2809 = sst [smem:[#allocation35_spill]] %s2789_s9 }
   0x9   :  { %2810 = sst [smem:[#allocation36_spill]] %s2790_s10 }
   0xa   :  { %15 = vsyncpa [#allocation6], 0 }
   0xb   :  { %17 = vsyncpa [#allocation6 + $0x1], 0 }
   0xc   :  { %18 = vsyncpa [#allocation9], 0 }
   0xd   :  { %19 = vsyncpa [#allocation12], 0 }
   0xe   :  { %21 = vsyncpa [#allocation12 + $0x1], 0 }
   0xf   :  { %22 = vsyncpa [#allocation7], 0 }
  0x10   :  { %24 = vsyncpa [#allocation7 + $0x1], 0  ;;  %s2348_s13 = smov 0   ;;  %s2350_s14 = smov 0  }
  0x11   :  { %s2352_s15 = smov 0   ;;  %s2354_s16 = smov 0  }
  0x12   :  { %s2356_s17 = smov 0   ;;  %s2358_s18 = smov 0  }
  0x13   :  { %s2360_s19 = smov 0   ;;  %s2362_s20 = smov 0  }
  0x14   :  { %s2364_s21 = smov 0   ;;  %s2366_s22 = smov 0  }
  0x15   :  { %s2368_s23 = smov 0  }
  0x16 LB: > { %2811 = sst [smem:[#allocation20_spill]] %s2237_s16  ;;  %s2404_s24 = sadd.s32 4294967295, %s2265_s23   ;;  %s2265_s23 = sphi %s2368_s23, %s30_s23   ;;  %s2261_s22 = sphi %s2366_s22, %s2856_s22   ;;  %s2257_s21 = sphi %s2364_s21, %s2855_s21   ;;  %s2253_s20 = sphi %s2362_s20, %s2854_s20   ;;  %s2249_s19 = sphi %s2360_s19, %s2853_s19   ;;  %s2245_s18 = sphi %s2358_s18, %s2862_s18   ;;  %s2241_s17 = sphi %s2356_s17, %s2861_s17   ;;  %s2237_s16 = sphi %s2354_s16, %s2860_s16   ;;  %s2233_s15 = sphi %s2352_s15, %s2859_s15   ;;  %s2229_s14 = sphi %s2350_s14, %s2858_s14   ;;  %s2225_s13 = sphi %s2348_s13, %s2857_s13  }
  0x17   : > { %2812 = sst [smem:[#allocation21_spill]] %s2253_s20  ;;  %p1624_p0 = scmp.ge.s32.totalorder %s2265_s23, 1 }
  0x18   : > { %2813 = sst [smem:[#allocation22_spill]] %s2257_s21  ;;  %p2792_p1 = scmp.eq.s32.totalorder %s2404_s24, 0 }
  0x19   : > { %2814 = sst [smem:[#allocation23_spill]] %s2261_s22  ;;  %p313_p2 = scmp.lt.s32.totalorder %s2265_s23, 5 }
  0x1a   : > { %s2267_s26 = smov [#allocation8]   ;;  %s2268_s28 = smov [#allocation13]  }
  0x1b   : > { %p2409_p3 = pnand %p1624_p0, %p313_p2  ;;  %s326_s27 = sshll.u32 %s2267_s26, 4  ;;  %s327_s27 = int_to_ptr.vmem [resolvable:$true] %s326_s27 }
  0x1c   : > { %s347_s29 = sshll.u32 %s2268_s28, 4  ;;  %s2269_s11 = smov [#allocation10]   ;;  %s348_s29 = int_to_ptr.vmem [resolvable:$true] %s347_s29 }
  0x1d   : > { %s2815_s25 = scalar_select %p2409_p3, 1, 0 }
  0x1e   : > { %p1827_p4 = pneg %p2409_p3  ;;  %s337_s12 = sshll.u32 %s2269_s11, 4  ;;  %s338_s12 = int_to_ptr.vmem [resolvable:$true] %s337_s12 }
  0x1f   : > { %s2010_s10 = scalar_lea.vmem %s327_s27, 128  ;;  %p2018_p10 = scmp.lt.s32.totalorder %s327_s27, %s327_s27 }
  0x20   : > { %p2417_p5 = pnand %p1827_p4, %p2792_p1  ;;  %p2011_p7 = scmp.ne.s32.totalorder %s327_s27, %s2010_s10 }
  0x21   : > { %p2019_p11 = scmp.lt.s32.totalorder %s2010_s10, %s2010_s10 }
  0x22   : > { %p2001_p6 = pneg %p2417_p5 }
  0x23   : > { %p2020_p12 = por %p2019_p11, %p2018_p10 }
  0x24   : > { %p2013_p8 = pnand %p2011_p7, %p2001_p6 }
  0x26   : > { %p2014_p9 = pneg %p2013_p8 }
  0x28   : > { %p2021_p13 = pnand %p2020_p12, %p2014_p9 }
  0x2a   : > { %2024 = shalt.err (!%p2021_p13)
}
  0x2b   : > { %s2817_s1 = sld [smem:[#allocation29_spill]]  ;;  %s2036_s11 = scalar_lea.vmem %s348_s29, 256 }
  0x2c   : > { %p2037_p0 = scmp.ne.s32.totalorder %s348_s29, %s2036_s11  ;;  %p2044_p7 = scmp.lt.s32.totalorder %s348_s29, %s348_s29 }
  0x2d   : > { %p2045_p8 = scmp.lt.s32.totalorder %s2036_s11, %s2036_s11 }
  0x2e   : > { %p2039_p2 = pnand %p2037_p0, %p2001_p6 }
  0x2f   : > { %p2046_p1 = por %p2045_p8, %p2044_p7 }
  0x30   : > { %p2040_p4 = pneg %p2039_p2 }
  0x31   : > { %1830 = dma.hbm_to_vmem [thread:$0]  (!%p2417_p5), %s2817_s1, 128, %s327_s27, [#allocation9]  }
  0x32   : > { %p2047_p3 = pnand %p2046_p1, %p2040_p4 }
  0x34   : > { %2050 = shalt.err (!%p2047_p3)
}
  0x35   : > { %s2270_s10 = smov 64   ;;  %s2271_s20 = smov 4  }
  0x36   : > { %s2818_s8 = sld [smem:[#allocation34_spill]]  ;;  %s2062_s27 = scalar_lea.vmem %s338_s12, 128 }
  0x37   : > { %p2063_p9 = scmp.ne.s32.totalorder %s338_s12, %s2062_s27  ;;  %p2070_p12 = scmp.lt.s32.totalorder %s338_s12, %s338_s12 }
  0x38   : > { %p2071_p13 = scmp.lt.s32.totalorder %s2062_s27, %s2062_s27 }
  0x39   : > { %p2065_p10 = pnand %p2063_p9, %p2001_p6 }
  0x3a   : > { %p2072_p1 = por %p2071_p13, %p2070_p12 }
  0x3b   : > { %p2066_p11 = pneg %p2065_p10 }
  0x3c   : > { %1836 = dma.hbm_to_vmem [thread:$0]  (!%p2417_p5), %s2818_s8, 256, %s348_s29, [#allocation12], %s2270_s10, %s2270_s10, %s2271_s20  }
  0x3d   : > { %p2073_p3 = pnand %p2072_p1, %p2066_p11 }
  0x3f   : > { %2076 = shalt.err (!%p2073_p3)
}
  0x40   : > { %s2819_s2 = sld [smem:[#allocation30_spill]]  ;;  %s1623_s9 = sadd.s32 4294967294, %s2265_s23  }
  0x41   : > { %p56_p6 = scmp.ne.s32.totalorder %s2245_s18, %s2241_s17  ;;  %p57_p0 = scmp.eq.s32.totalorder %s2265_s23, 0 }
  0x42   : > { %p62_p2 = scmp.ne.s32.totalorder %s2241_s17, %s2237_s16  ;;  %p300_p4 = scmp.eq.s32.totalorder %s2404_s24, 3 }
  0x43   : > { %p58_p7 = por %p57_p0, %p56_p6  ;;  %p306_p8 = scmp.eq.s32.totalorder %s1623_s9, 3 }
  0x44   : > { %p2820_p9 = scmp.eq.s32.totalorder %s2404_s24, 0  ;;  %p2464_p11 = por %p300_p4, %p56_p6 }
  0x45   : > { %p1851_p12 = scmp.lt.s32.totalorder %s2265_s23, 4  ;;  %s364_s26 = sand.u32 1, %s2245_s18  }
  0x46   : > { %1833 = dma.hbm_to_vmem [thread:$0]  (!%p2417_p5), %s2819_s2, 128, %s338_s12, [#allocation9]  }
  0x47   : > { %p2460_p10 = por %p2820_p9, %p62_p2  ;;  %p2468_p5 = por %p306_p8, %p62_p2 }
  0x48   : > { %s2822_s10 = scalar_select %p2464_p11, 1, 0 }
  0x49   : > { %s2824_s12 = scalar_select %p2468_p5, 1, 0 }
  0x4a   : > { %2823 = sst [smem:[#allocation24_spill]] %s2822_s10  ;;  %s1630_s27 = sshll.u32 %s2261_s22, 6 }
  0x4b   : > { %2825 = sst [smem:[#allocation25_spill]] %s2824_s12  ;;  %s1629_s28 = sshll.u32 %s364_s26, 2 }
  0x4c   : > { %s2826_s0 = sld [smem:[#allocation28_spill]]  ;;  %s368_s20 = scalar_lea.vmem [#allocation5], %s1629_s28 }
  0x4d   : > { %s375_s1 = sshll.u32 %s368_s20, 4  ;;  %p2480_p13 = pnand %p1851_p12, %p58_p7  ;;  %s376_s1 = int_to_ptr.vmem [resolvable:$true] %s375_s1 }
  0x4e   : > { %s365_s8 = scalar_lea.sflag [#allocation6], %s364_s26  ;;  %s2090_s12 = scalar_lea.vmem %s376_s1, 64 }
  0x4f   : > { %p2079_p1 = pneg %p2480_p13  ;;  %p2091_p3 = scmp.ne.s32.totalorder %s376_s1, %s2090_s12 }
  0x50   : > { %s2272_s16 = smov [#allocation5]  }
  0x51   : > { %p2093_p6 = pnand %p2091_p3, %p2079_p1  ;;  %s2095_s10 = sshll.u32 %s2272_s16, 4  ;;  %s2096_s10 = int_to_ptr.vmem [resolvable:$false] %s2095_s10 }
  0x52   : > { %s373_s9 = scalar_lea.hbm %s2826_s0, %s1630_s27  ;;  %s2097_s29 = scalar_lea.vmem %s2096_s10, 128 }
  0x53   : > { %p2094_p2 = pneg %p2093_p6  ;;  %p2098_p4 = scmp.lt.s32.totalorder %s376_s1, %s2096_s10 }
  0x54   : > { %p2099_p8 = scmp.lt.s32.totalorder %s2097_s29, %s2090_s12 }
  0x56   : > { %p2100_p9 = por %p2099_p8, %p2098_p4 }
  0x58   : > { %p2101_p7 = pnand %p2100_p9, %p2094_p2 }
  0x5a   : > { %2104 = shalt.err (!%p2101_p7)
}
  0x5b   : > { %1840 = dma.hbm_to_vmem [thread:$0]  (!%p2480_p13), %s373_s9, 64, %s376_s1, %s365_s8  }
  0x5c   : > { %s39_s16 = sadd.s32 1, %s2257_s21  ;;  %s169_s20 = sadd.s32 1, %s2233_s15 }
  0x5d   : > { %p40_p1 = scmp.ge.s32.totalorder %s39_s16, 2  ;;  %p176_p3 = scmp.ne.s32.totalorder %s2233_s15, %s2229_s14 }
  0x5e   : > { %p182_p6 = scmp.ne.s32.totalorder %s2229_s14, %s2225_s13  ;;  %s398_s2 = sand.u32 1, %s2265_s23  }
  0x5f   : > { %s2864_s16 = smov (%p40_p1, %s39_s16), 0  ;;  %s2829_s10 = sadd.s32 1, %s2261_s22 }
  0x60   : > { %2828 = sst [smem:[#allocation26_spill]] %s2864_s16  ;;  %s2866_s10 = smov (!%p40_p1, %s2829_s10), %s2261_s22 }
  0x61   : > { %s166_s12 = ssub.s32 %s2257_s21, %s2864_s16  ;;  %p2504_p2 = por %p176_p3, %p57_p0 }
  0x62   : > { %p44_p13 = scmp.ge.s32.totalorder %s2866_s10, 2  ;;  %p167_p4 = scmp.eq.s32.totalorder %s166_s12, 0 }
  0x63   : > { %p2831_p8 = scmp.eq.s32.totalorder %s2404_s24, 0  ;;  %s400_s27 = sand.u32 1, %s2233_s15  }
  0x64   : > { %s2868_s10 = smov (%p44_p13, %s2866_s10), 0  ;;  %s1631_s28 = sshll.u32 %s400_s27, 3 }
  0x65   : > { %p2510_p9 = por %p182_p6, %p2831_p8  ;;  %2833 = sst [smem:[#allocation27_spill]] %s2868_s10 }
  0x66   : > { %s2517_s13 = scalar_select %p167_p4, %s2233_s15, %s169_s20  }
  0x67   : > { %s46_s26 = ssub.s32 %s2261_s22, %s2868_s10  ;;  %s1632_s11 = sshll.u32 %s2257_s21, 7 }
  0x68   : > { %p47_p0 = scmp.eq.s32.totalorder %s46_s26, 0  ;;  %s2834_s9 = sadd.s32 1, %s2245_s18 }
  0x69   : > { %s2835_s5 = sld [smem:[#allocation31_spill]]  ;;  %s402_s7 = scalar_lea.vmem [#allocation11], %s1631_s28 }
  0x6a   : > { %s2526_s29 = scalar_select %p47_p0, %s2245_s18, %s2834_s9  }
  0x6b   : > { %s409_s6 = sshll.u32 %s402_s7, 4  ;;  %p2535_p7 = pnand %p1851_p12, %p2504_p2  ;;  %s410_s6 = int_to_ptr.vmem [resolvable:$true] %s409_s6 }
  0x6c   : > { %s399_s26 = scalar_lea.sflag [#allocation12], %s398_s2  ;;  %s2118_s27 = scalar_lea.vmem %s410_s6, 128 }
  0x6d   : > { %p2107_p1 = pneg %p2535_p7  ;;  %p2119_p3 = scmp.ne.s32.totalorder %s410_s6, %s2118_s27 }
  0x6e   : > { %s2273_s9 = smov [#allocation11]  }
  0x6f   : > { %s407_s16 = scalar_lea.hbm %s2835_s5, %s1632_s11  ;;  %p2121_p6 = pnand %p2119_p3, %p2107_p1 }
  0x70   : > { %s2123_s0 = sshll.u32 %s2273_s9, 4  ;;  %s2124_s0 = int_to_ptr.vmem [resolvable:$false] %s2123_s0 }
  0x71   : > { %p2122_p13 = pneg %p2121_p6  ;;  %s2125_s28 = scalar_lea.vmem %s2124_s0, 256 }
  0x72   : > { %p2126_p4 = scmp.lt.s32.totalorder %s410_s6, %s2124_s0  ;;  %p2127_p8 = scmp.lt.s32.totalorder %s2125_s28, %s2118_s27 }
  0x74   : > { %p2128_p0 = por %p2127_p8, %p2126_p4 }
  0x76   : > { %p2129_p5 = pnand %p2128_p0, %p2122_p13 }
  0x78   : > { %2132 = shalt.err (!%p2129_p5)
}
  0x79   : > { %1843 = dma.hbm_to_vmem [thread:$0]  (!%p2535_p7), %s407_s16, 128, %s410_s6, %s399_s26  }
  0x7a   : > { %p2837_p12 = scmp.ne.s32.totalorder %s2815_s25, 0 }
  0x7b   : > { %s2546_s7 = sand.u32 (!%p2837_p12), 1, %s2241_s17  }
  0x7c   : > { %434 = sbr.rel (%p2837_p12) target bundleno = 2664 (0xa68), region = 60  ;;  %s1634_s2 = sshll.u32 (!%p2837_p12), %s2546_s7, 2 }
  0x7d   : > { %s437_s1 = scalar_lea.sflag (!%p2837_p12), [#allocation6], %s2546_s7  ;;  %s440_s11 = scalar_lea.vmem (!%p2837_p12), [#allocation5], %s1634_s2 }
  0x81   : > { %2204 = dma.done.wait (%p2460_p10), %s437_s1, 64  }
  0x82   : > { %2206 = vsyncadd (%p2460_p10), %s437_s1, 4294967232  ;;  %p2838_p5 = scmp.eq.s32.totalorder %s2404_s24, 0 }
  0x84   : > { %2208 = dma.done.wait (%p2838_p5), [#allocation9], 256   ;;  %p2839_p2 = pmov %p2838_p5 }
  0x85   : > { %s453_s6 = sand.u32 1, %s2404_s24   ;;  %s455_s25 = sand.u32 1, %s2229_s14  }
  0x86   : > { %2210 = vsyncadd (%p2839_p2), [#allocation9], 4294967040  ;;  %s2560_s16 = sshll.u32 %s455_s25, 3  ;;  %s454_s12 = scalar_lea.sflag [#allocation12], %s453_s6 }
  0x87   : > { %2212 = dma.done.wait (%p2510_p9), %s454_s12, 128  }
  0x88   : > { %2214 = vsyncadd (%p2510_p9), %s454_s12, 4294967168  ;;  %p2840_p10 = pmov %p2839_p2 }
  0x89   : > { %p2841_p7 = pmov %p2839_p2 }
  0x8a   : > { %2216 = dma.done.wait (%p2840_p10), [#allocation12], 256  }
  0x8b   : > { %2218 = vsyncadd (%p2841_p7), [#allocation12], 4294967040  ;;  %s1639_s30 = sshll.u32 %s2546_s7, 3  ;;  %p523_p1 = scmp.lt.s32.totalorder %s2249_s19, 1 }
  0x8c   : > { %s2842_s12 = sld [smem:[#allocation32_spill]]  ;;  %p1648_p9 = scmp.ne.s32.totalorder %s2249_s19, 0 }
  0x8d   : > { %s524_s26 = scalar_select %p523_p1, %s2249_s19, 1 }
  0x8e   : > { %s2843_s22 = sld [smem:[#allocation33_spill]] }
  0x8f   : > { %s1680_s27 = sshll.u32 %s524_s26, 4  ;;  %s1683_s9 = sshll.u32 %s524_s26, 5 }
  0x90   : > { %s527_s2 = scalar_lea.vmem %s2783_s3, %s1680_s27  ;;  %s2580_s6 = scalar_lea.vmem %s2784_s4, %s1680_s27 }
  0x91   : > { %s2592_s26 = scalar_lea.vmem [#allocation14], %s1639_s30  ;;  %547 = sbr.rel (%p1648_p9) target bundleno = 156 (0x9c), region = 84 }
  0x92   : > { %s2585_s20 = scalar_lea.vmem %s2842_s12, %s1680_s27 }
  0x94   : > { %s2590_s21 = scalar_lea.vmem %s2843_s22, %s1683_s9 }
  0x96   : > { %v548_v0 = vld [vmem:[%s440_s11] sm:$0xf]  ;;  %v550_v1 = vld [vmem:[#allocation8] sm:$0xff]  ;;  %vm552_vm0 = vcmask 261120  }
  0x97   : > { %v549_v2 = vunpack.c.l.bf16 %v548_v0 }
  0x99   : > { %v551_v3 = vadd.f32 %v550_v1, %v549_v2 }
  0x9b   : > { %553 = vst.msk [vmem:[#allocation2] sm:$0xff] %vm552_vm0, %v551_v3 }
  0x9c PF: > { %v1967_v4 = vld [vmem:[%s527_s2 + $0x8] sm:$0xff]   ;;  %v2274_v5 = vmov 0.0   ;;  %v1968_v6 = vld [vmem:[%s527_s2] sm:$0xff]   ;;  %vm2275_vm1 = vmmov 0   ;;  %vm577_vm2 = vcmask 261120   ;;  %v561_v9 = vlaneseq  ;;  %s2844_s5 = scalar_lea.vmem [#allocation11], %s2560_s16 }
  0x9d   : > { %1717 = vmatprep.subr.bf16.mxu0 %v2274_v5  ;;  %1725 = vmatprep.subr.bf16.mxu1 %v2274_v5  ;;  %v2615_v12 = vld [vmem:[%s2844_s5] sm:$0xff]  ;;  %vm621_vm3 = vcmask 785408   ;;  %s2276_s22 = smov 120   ;;  %s2277_s10 = smov 96   ;;  %vm629_vm4 = vcmask 64512   ;;  %v623_v32 = vld [vmem:[#allocation10] sm:$0xff] }
  0x9e   : > { %1718 = vmatpush3.bf16.msra.mxu0 %v1967_v4  ;;  %1721 = vmatprep.mubr.msk.bf16.mxu0 %vm2275_vm1, %v2274_v5  ;;  %v2610_v10 = vshrl.u32 %v561_v9, 7  ;;  %s2278_s11 = smov 80   ;;  %s2279_s16 = smov 88   ;;  %vm691_vm5 = vcmask 1043456   ;;  %vm855_vm6 = vcmask 130112   ;;  %vm974_vm7 = vcmask 195712  }
  0x9f   : > { %1719 = vmatprep.subr.bf16.mxu0 %v2274_v5  ;;  %1727 = vmatprep.mubr.msk.bf16.mxu1 %vm2275_vm1, %v2274_v5  ;;  %s2280_s30 = smov 72   ;;  %s2281_s27 = smov 112   ;;  %vm1093_vm8 = vcmask 261312   ;;  %vm1287_vm9 = vcmask 523264  }
  0xa0   : > { %v563_v11 = vsub.s32 0, %v2610_v10  ;;  %s2282_s9 = smov 104   ;;  %s2283_s0 = smov 56  }
  0xa1   : > { %s2284_s28 = smov 64   ;;  %s2285_s2 = smov 40  }
  0xa2   : > { %v2599_v7 = vld [vmem:[#allocation2] sm:$0xff]  ;;  %1720 = vmatpush3.bf16.msra.mxu0 %v1968_v6  ;;  %v564_v13 = vrot.slane %v2615_v12, %v563_v11  ;;  %s2286_s8 = smov 48   ;;  %s2287_s1 = smov 8  }
  0xa3   : > { %v556_v8 = vpack.c.bf16 %v2599_v7, %v2599_v7  ;;  %1731 = vmatprep.subr.bf16.mxu0 %v2274_v5  ;;  %s2288_s25 = smov 16   ;;  %s2289_s24 = smov 24  }
  0xa4   : > { %p1671_p3 = scmp.ne.s32.totalorder %s2249_s19, 1 }
  0xa5   : > { %1722 = vmatmul.mubr.msk.bf16.vlgmr.msra.gmra.mxu0 %vm577_vm2, %v556_v8 }
  0xa6   : > { %1733 = vmatprep.mubr.msk.bf16.mxu0 %vm2275_vm1, %v2274_v5 }
 0x165   : > { %v615_v14 = vpop.f32.mrf.mxu0 }
 0x166   : > { %v616_v15 = vadd.f32 %v615_v14, %v564_v13 }
 0x167   : > { %v1723_v16 = vpop.f32.mrf.mxu0 }
 0x168   : > { %622 = vst.msk [vmem:[#allocation3] sm:$0xff] %vm621_vm3, %v616_v15 }
 0x169   : > { %v618_v17 = vpop.f32.mrf.mxu0 }
 0x16b   : > { %v1724_v18 = vpop.f32.mrf.mxu0 }
 0x16f   : > { %v738_v19 = vld [vmem:[#allocation3] sm:$0xff] }
 0x170   : > { %v2618_v20 = vpack.c.bf16 %v738_v19, %v738_v19 }
 0x172   : > { %741 = vrot.lane.b32.xlu1 %v2618_v20, %s2276_s22  ;;  %627 = vrot.lane.b32.xlu0 %v2618_v20, %s2277_s10 }
 0x176   : > { %862 = vrot.lane.b32.xlu1 %v2618_v20, %s2278_s11  ;;  %743 = vrot.lane.b32.xlu0 %v2618_v20, %s2279_s16 }
 0x17a   : > { %981 = vrot.lane.b32.xlu1 %v2618_v20, %s2280_s30  ;;  %860 = vrot.lane.b32.xlu0 %v2618_v20, %s2281_s27 }
 0x17e   : > { %979 = vrot.lane.b32.xlu0 %v2618_v20, %s2282_s9 }
 0x1e4   : > { %v628_v21 = vpop.permute.xlu0 %627  ;;  %v742_v24 = vpop.permute.xlu1 %741 }
 0x1e5   : > { %v634_v22 = vsel %vm629_vm4, %v628_v21, 0 }
 0x1e6   : > { %1726 = vmatpush3.bf16.xpose.msra.mxu1 %v634_v22 }
 0x1e7   : > { %1737 = vmatprep.subr.bf16.mxu1 %v2274_v5 }
 0x1e8   : > { %v744_v23 = vpop.permute.xlu0 %743  ;;  %v863_v26 = vpop.permute.xlu1 %862 }
 0x1e9   : > { %v749_v25 = vsel %vm629_vm4, %v744_v23, 0  ;;  %v868_v27 = vsel %vm629_vm4, %v863_v26, 0 }
 0x1ec   : > { %v982_v28 = vpop.permute.xlu1 %981  ;;  %v861_v29 = vpop.permute.xlu0 %860 }
 0x1ed   : > { %1728 = vmatmul.mubr.msk.bf16.vlgmr.msra.gmra.mxu1 %vm629_vm4, %v2618_v20  ;;  %v987_v30 = vsel %vm629_vm4, %v982_v28, 0 }
 0x1ee   : > { %1738 = vmatpush3.bf16.xpose.msra.mxu1 %v749_v25  ;;  %1739 = vmatprep.mubr.msk.bf16.mxu1 %vm2275_vm1, %v2274_v5 }
 0x1ef   : > { %1749 = vmatprep.subr.bf16.mxu1 %v2274_v5 }
 0x1f0   : > { %v980_v31 = vpop.permute.xlu0 %979 }
 0x1f5   : > { %1740 = vmatmul.mubr.msk.bf16.vlgmr.msra.gmra.mxu1 %vm629_vm4, %v742_v24 }
 0x1f6   : > { %1750 = vmatpush3.bf16.xpose.msra.mxu1 %v868_v27  ;;  %1751 = vmatprep.mubr.msk.bf16.mxu1 %vm2275_vm1, %v2274_v5 }
 0x1f7   : > { %1761 = vmatprep.subr.bf16.mxu1 %v2274_v5 }
 0x1fd   : > { %1752 = vmatmul.mubr.msk.bf16.vlgmr.msra.gmra.mxu1 %vm629_vm4, %v861_v29 }
 0x1fe   : > { %1762 = vmatpush3.bf16.xpose.msra.mxu1 %v987_v30  ;;  %1763 = vmatprep.mubr.msk.bf16.mxu1 %vm2275_vm1, %v2274_v5 }
 0x1ff   : > { %1773 = vmatprep.subr.bf16.mxu1 %v2274_v5 }
 0x205   : > { %1764 = vmatmul.mubr.msk.bf16.vlgmr.msra.gmra.mxu1 %vm629_vm4, %v980_v31 }
 0x206   : > { %1777 = vmatprep.mubr.msk.bf16.mxu1 %vm2275_vm1, %v2274_v5 }
 0x2ad   : > { %v670_v33 = vpop.f32.mrf.mxu1 }
 0x2ae   : > { %v671_v34 = vadd.f32 %v670_v33, %v623_v32 }
 0x2af   : > { %v1729_v35 = vpop.f32.mrf.mxu1 }
 0x2b0   : > { %v676_v36 = vsel %vm629_vm4, %v671_v34, -inf }
 0x2b1   : > { %677 = vmax.xlane.f32.xlu1 %v676_v36  ;;  %v673_v37 = vpop.f32.mrf.mxu1 }
 0x2b3   : > { %v1730_v38 = vpop.f32.mrf.mxu1 }
 0x2b5   : > { %v785_v39 = vpop.f32.mrf.mxu1 }
 0x2b6   : > { %v786_v40 = vadd.f32 %v785_v39, %v623_v32 }
 0x2b7   : > { %v1741_v41 = vpop.f32.mrf.mxu1 }
 0x2b8   : > { %v791_v42 = vsel %vm629_vm4, %v786_v40, -inf }
 0x2b9   : > { %792 = vmax.xlane.f32.xlu0 %v791_v42  ;;  %v788_v43 = vpop.f32.mrf.mxu1 }
 0x2bb   : > { %v1742_v44 = vpop.f32.mrf.mxu1 }
 0x2bd   : > { %v904_v45 = vpop.f32.mrf.mxu1 }
 0x2be   : > { %v905_v46 = vadd.f32 %v904_v45, %v623_v32 }
 0x2bf   : > { %v1753_v47 = vpop.f32.mrf.mxu1 }
 0x2c0   : > { %v910_v48 = vsel %vm629_vm4, %v905_v46, -inf }
 0x2c1   : > { %911 = vmax.xlane.f32.xlu0 %v910_v48  ;;  %v907_v49 = vpop.f32.mrf.mxu1 }
 0x2c2   : > { %801 = vrot.lane.b32.xlu1 %v2618_v20, %s2283_s0  ;;  %v1969_v49 = vld [vmem:[%s2580_s6 + $0x8] sm:$0xff]  }
 0x2c3   : > { %v1754_v50 = vpop.f32.mrf.mxu1  ;;  %1774 = vmatpush3.bf16.msra.mxu1 %v1969_v49 }
 0x2c4   : > { %1775 = vmatprep.subr.bf16.mxu1 %v2274_v5 }
 0x2c5   : > { %v1023_v51 = vpop.f32.mrf.mxu1 }
 0x2c6   : > { %v1024_v55 = vadd.f32 %v1023_v51, %v623_v32  ;;  %v1970_v51 = vld [vmem:[%s2580_s6] sm:$0xff]   ;;  %s2845_s6 = sld [smem:[#allocation35_spill]] (!%p1671_p3) }
 0x2c7   : > { %v1765_v52 = vpop.f32.mrf.mxu1  ;;  %1776 = vmatpush3.bf16.msra.mxu1 %v1970_v51 }
 0x2c8   : > { %v1029_v56 = vsel %vm629_vm4, %v1024_v55, -inf  ;;  %1789 = vmatprep.subr.bf16.mxu1 %v2274_v5 }
 0x2c9   : > { %v1026_v53 = vpop.f32.mrf.mxu1 }
 0x2cb   : > { %v1766_v54 = vpop.f32.mrf.mxu1 }
 0x2d7   : > { %686 = vrot.lane.b32.xlu0 %v2618_v20, %s2284_s28 }
 0x2db   : > { %1039 = vrot.lane.b32.xlu0 %v2618_v20, %s2285_s2 }
 0x2e6   : > { %1030 = vmax.xlane.f32.xlu1 %v1029_v56 }
 0x2f7   : > { %920 = vrot.lane.b32.xlu1 %v2618_v20, %s2286_s8 }
 0x33a   : > { %v678_v57 = vpop.xlane.xlu1 %677 }
 0x33b   : > { %v679_v58 = vsub.f32 %v671_v34, %v678_v57 }
 0x33d   : > { %v680_v59 = vmul.f32 1.442695, %v679_v58 }
 0x33e   : > { %v802_v6 = vpop.permute.xlu1 %801 }
 0x33f   : > { %1977 = vpow2.f32 %v680_v59  ;;  %v807_v9 = vsel %vm691_vm5, %v802_v6, 0 }
 0x342   : > { %v793_v60 = vpop.xlane.xlu0 %792 }
 0x343   : > { %v794_v61 = vsub.f32 %v786_v40, %v793_v60 }
 0x345   : > { %v795_v62 = vmul.f32 1.442695, %v794_v61 }
 0x347   : > { %1979 = vpow2.f32 %v795_v62 }
 0x34a   : > { %v912_v63 = vpop.xlane.xlu0 %911 }
 0x34b   : > { %v913_v0 = vsub.f32 %v905_v46, %v912_v63 }
 0x34c   : > { %v1978_v2 = vpop.eup %1977 }
 0x34d   : > { %v914_v1 = vmul.f32 1.442695, %v913_v0  ;;  %v685_v8 = vpack.c.bf16 %v1978_v2, %v1978_v2  ;;  %v682_v14 = vsel %vm629_vm4, %v1978_v2, 0.0  ;;  %v1103_v0 = vsub.s32 1, %v2610_v10 }
 0x34e   : > { %v687_v3 = vpop.permute.xlu0 %686 }
 0x34f   : > { %1981 = vpow2.f32 %v914_v1  ;;  %v693_v4 = vsel %vm691_vm5, %v687_v3, 0  ;;  %v1104_v1 = vrot.slane %v2615_v12, %v1103_v0 }
 0x350   : > { %1732 = vmatpush3.bf16.msra.mxu0 %v693_v4 }
 0x351   : > { %1743 = vmatprep.subr.bf16.mxu0 %v2274_v5 }
 0x352   : > { %v1040_v23 = vpop.permute.xlu0 %1039 }
 0x353   : > { %1734 = vmatmul.mubr.msk.bf16.vlgmr.msra.gmra.mxu0 %vm629_vm4, %v685_v8  ;;  %v1045_v25 = vsel %vm691_vm5, %v1040_v23, 0 }
 0x354   : > { %v1980_v11 = vpop.eup %1979  ;;  %1744 = vmatpush3.bf16.msra.mxu0 %v807_v9  ;;  %1745 = vmatprep.mubr.msk.bf16.mxu0 %vm2275_vm1, %v2274_v5 }
 0x355   : > { %v797_v13 = vsel %vm629_vm4, %v1980_v11, 0.0  ;;  %1755 = vmatprep.subr.bf16.mxu0 %v2274_v5  ;;  %v800_v15 = vpack.c.bf16 %v1980_v11, %v1980_v11 }
 0x356   : > { %798 = vadd.xlane.f32.xlu1 %v797_v13 }
 0x35a   : > { %683 = vadd.xlane.f32.xlu1 %v682_v14 }
 0x35b   : > { %1746 = vmatmul.mubr.msk.bf16.vlgmr.msra.gmra.mxu0 %vm629_vm4, %v800_v15 }
 0x35c   : > { %v1982_v16 = vpop.eup %1981  ;;  %1757 = vmatprep.mubr.msk.bf16.mxu0 %vm2275_vm1, %v2274_v5 }
 0x35d   : > { %v916_v17 = vsel %vm629_vm4, %v1982_v16, 0.0  ;;  %v919_v24 = vpack.c.bf16 %v1982_v16, %v1982_v16 }
 0x35e   : > { %917 = vadd.xlane.f32.xlu0 %v916_v17 }
 0x36f   : > { %v1031_v18 = vpop.xlane.xlu1 %1030 }
 0x370   : > { %v1032_v19 = vsub.f32 %v1024_v55, %v1031_v18  ;;  %v1971_v18 = vld [vmem:[%s2585_s20 + $0x8] sm:$0xff]  }
 0x372   : > { %v1033_v20 = vmul.f32 1.442695, %v1032_v19  ;;  %v1972_v19 = vld [vmem:[%s2585_s20] sm:$0xff]  }
 0x373   : > { %v921_v21 = vpop.permute.xlu1 %920 }
 0x374   : > { %1983 = vpow2.f32 %v1033_v20  ;;  %v926_v22 = vsel %vm691_vm5, %v921_v21, 0  ;;  %v1974_v20 = vld [vmem:[%s2590_s21 + $0x10] sm:$0xff]  }
 0x375   : > { %1756 = vmatpush3.bf16.msra.mxu0 %v926_v22 }
 0x376   : > { %1767 = vmatprep.subr.bf16.mxu0 %v2274_v5 }
 0x378   : > { %1758 = vmatmul.mubr.msk.bf16.vlgmr.msra.gmra.mxu0 %vm629_vm4, %v919_v24  ;;  %v1177_v24 = vsub.s32 2, %v2610_v10 }
 0x379   : > { %1768 = vmatpush3.bf16.msra.mxu0 %v1045_v25  ;;  %1769 = vmatprep.mubr.msk.bf16.mxu0 %vm2275_vm1, %v2274_v5  ;;  %v1182_v25 = vsub.s32 3, %v2610_v10 }
 0x37a   : > { %1781 = vmatprep.subr.bf16.mxu0 %v2274_v5 }
 0x381   : > { %v1984_v26 = vpop.eup %1983 }
 0x382   : > { %v1035_v27 = vsel %vm629_vm4, %v1984_v26, 0.0  ;;  %v1038_v28 = vpack.c.bf16 %v1984_v26, %v1984_v26  ;;  %v1178_v26 = vrot.slane %v2615_v12, %v1177_v24 }
 0x383   : > { %1036 = vadd.xlane.f32.xlu0 %v1035_v27 }
 0x384   : > { %1770 = vmatmul.mubr.msk.bf16.vlgmr.msra.gmra.mxu0 %vm629_vm4, %v1038_v28 }
 0x385   : > { %1785 = vmatprep.mubr.msk.bf16.mxu0 %vm2275_vm1, %v2274_v5  ;;  %1782 = vmatpush3.bf16.msra.mxu0 %v1971_v18 }
 0x386   : > { %1783 = vmatprep.subr.bf16.mxu0 %v2274_v5 }
 0x389   : > { %1784 = vmatpush3.bf16.msra.mxu0 %v1972_v19 }
 0x3df   : > { %v799_v29 = vpop.xlane.xlu1 %798 }
 0x3e3   : > { %v684_v30 = vpop.xlane.xlu1 %683 }
 0x3e4   : > { %1985 = vrcp.f32 %v684_v30 }
 0x3e5   : > { %1987 = vrcp.f32 %v799_v29  ;;  %v1183_v29 = vrot.slane %v2615_v12, %v1182_v25 }
 0x3e7   : > { %v918_v43 = vpop.xlane.xlu0 %917 }
 0x3e8   : > { %1989 = vrcp.f32 %v918_v43 }
 0x3f1   : > { %v1986_v31 = vpop.eup %1985 }
 0x3f2   : > { %v1988_v37 = vpop.eup %1987 }
 0x3f5   : > { %v1990_v45 = vpop.eup %1989 }
 0x40c   : > { %v1037_v44 = vpop.xlane.xlu0 %1036 }
 0x40d   : > { %1991 = vrcp.f32 %v1037_v44  ;;  %v1261_v44 = vsub.s32 5, %v2610_v10 }
 0x413   : > { %v729_v32 = vpop.f32.mrf.mxu0 }
 0x414   : > { %v736_v33 = vmul.f32 %v1986_v31, %v729_v32 }
 0x415   : > { %v1735_v34 = vpop.f32.mrf.mxu0 }
 0x416   : > { %737 = vst.msk [vmem:[#allocation4] sm:$0xff] %vm629_vm4, %v736_v33  ;;  %v1975_v33 = vld [vmem:[%s2590_s21 + $0x8] sm:$0xff]   ;;  %v1976_v34 = vld [vmem:[%s2590_s21] sm:$0xff]  }
 0x417   : > { %v732_v35 = vpop.f32.mrf.mxu0 }
 0x418   : > { %v1192_v35 = vsub.s32 4, %v2610_v10 }
 0x419   : > { %v1736_v36 = vpop.f32.mrf.mxu0 }
 0x41a   : > { %v1992_v53 = vpop.eup %1991  ;;  %v1193_v36 = vrot.slane %v2615_v12, %v1192_v35 }
 0x41b   : > { %v843_v38 = vpop.f32.mrf.mxu0 }
 0x41c   : > { %v850_v39 = vmul.f32 %v1988_v37, %v843_v38 }
 0x41d   : > { %v1747_v40 = vpop.f32.mrf.mxu0 }
 0x41e   : > { %852 = vrot.lane.b32.xlu0 %v850_v39, %s2287_s1 }
 0x41f   : > { %v846_v41 = vpop.f32.mrf.mxu0 }
 0x421   : > { %v1748_v42 = vpop.f32.mrf.mxu0 }
 0x438   : > { %v962_v46 = vpop.f32.mrf.mxu0 }
 0x439   : > { %v969_v47 = vmul.f32 %v1990_v45, %v962_v46  ;;  %v1262_v45 = vrot.slane %v2615_v12, %v1261_v44 }
 0x43a   : > { %v1759_v48 = vpop.f32.mrf.mxu0 }
 0x43b   : > { %971 = vrot.lane.b32.xlu1 %v969_v47, %s2288_s25 }
 0x43c   : > { %v965_v50 = vpop.f32.mrf.mxu0 }
 0x43e   : > { %v1760_v52 = vpop.f32.mrf.mxu0 }
 0x444   : > { %v1081_v54 = vpop.f32.mrf.mxu0 }
 0x445   : > { %v1088_v55 = vmul.f32 %v1992_v53, %v1081_v54 }
 0x446   : > { %v1771_v56 = vpop.f32.mrf.mxu0 }
 0x447   : > { %1090 = vrot.lane.b32.xlu1 %v1088_v55, %s2289_s24 }
 0x448   : > { %v1084_v57 = vpop.f32.mrf.mxu0 }
 0x44a   : > { %v1772_v58 = vpop.f32.mrf.mxu0 }
 0x490   : > { %v853_v59 = vpop.permute.xlu0 %852 }
 0x491   : > { %856 = vst.msk [vmem:[#allocation4] sm:$0xff] %vm855_vm6, %v853_v59 }
 0x4ad   : > { %v972_v60 = vpop.permute.xlu1 %971 }
 0x4ae   : > { %975 = vst.msk [vmem:[#allocation4] sm:$0xff] %vm974_vm7, %v972_v60  ;;  %v1347_v60 = vsub.s32 6, %v2610_v10 }
 0x4b9   : > { %v1091_v61 = vpop.permute.xlu1 %1090 }
 0x4ba   : > { %1094 = vst.msk [vmem:[#allocation4] sm:$0xff] %vm1093_vm8, %v1091_v61  ;;  %v1352_v61 = vsub.s32 7, %v2610_v10 }
 0x4bc   : > { %v1353_v0 = vrot.slane %v2615_v12, %v1352_v61 }
 0x4c1   : > { %v1095_v62 = vld [vmem:[#allocation4] sm:$0xff] }
 0x4c2   : > { %v1096_v63 = vpack.c.bf16 %v1095_v62, %v1095_v62  ;;  %v1348_v62 = vrot.slane %v2615_v12, %v1347_v60 }
 0x4c4   : > { %1778 = vmatmul.mubr.msk.bf16.vlgmr.msra.gmra.mxu1 %vm577_vm2, %v1096_v63 }
 0x4c5   : > { %1797 = vmatprep.mubr.msk.bf16.mxu1 %vm2275_vm1, %v2274_v5 }
 0x584   : > { %v1154_v2 = vpop.f32.mrf.mxu1 }
 0x585   : > { %v1155_v3 = vadd.f32 %v1154_v2, %v1104_v1 }
 0x586   : > { %v1779_v4 = vpop.f32.mrf.mxu1 }
 0x587   : > { %v1160_v6 = vadd.f32 %v1155_v3, %v2599_v7  ;;  %v1973_v7 = vld [vmem:[%s2590_s21 + $0x18] sm:$0xff]  }
 0x588   : > { %v1157_v8 = vpop.f32.mrf.mxu1  ;;  %1790 = vmatpush3.bf16.msra.mxu1 %v1973_v7 }
 0x589   : > { %v1161_v9 = vsel %vm577_vm2, %v1160_v6, 0.0  ;;  %1791 = vmatprep.subr.bf16.mxu1 %v2274_v5 }
 0x58a   : > { %1162 = vadd.xlane.f32.xlu0 %v1161_v9  ;;  %v1780_v11 = vpop.f32.mrf.mxu1 }
 0x58c   : > { %1792 = vmatpush3.bf16.msra.mxu1 %v1974_v20 }
 0x58d   : > { %1793 = vmatprep.subr.bf16.mxu1 %v2274_v5 }
 0x590   : > { %1794 = vmatpush3.bf16.msra.mxu1 %v1975_v33 }
 0x591   : > { %1795 = vmatprep.subr.bf16.mxu1 %v2274_v5 }
 0x594   : > { %1796 = vmatpush3.bf16.msra.mxu1 %v1976_v34 }
 0x613   : > { %v1163_v13 = vpop.xlane.xlu0 %1162 }
 0x614   : > { %v1165_v14 = vmul.f32 0.03125, %v1163_v13 }
 0x616   : > { %v1166_v15 = vsub.f32 %v1160_v6, %v1165_v14 }
 0x618   : > { %v1167_v16 = vmul.f32 %v1166_v15, %v1166_v15 }
 0x61a   : > { %v1168_v17 = vsel %vm577_vm2, %v1167_v16, 0.0 }
 0x61b   : > { %1169 = vadd.xlane.f32.xlu1 %v1168_v17 }
 0x6a4   : > { %v1170_v21 = vpop.xlane.xlu1 %1169 }
 0x6a5   : > { %v1171_v22 = vmul.f32 0.03125, %v1170_v21 }
 0x6a7   : > { %v1172_v23 = vadd.f32 1e-05, %v1171_v22 }
 0x6a9   : > { %1993 = vrsqrt.f32 %v1172_v23 }
 0x6b6   : > { %v1994_v27 = vpop.eup %1993 }
 0x6b7   : > { %v1174_v28 = vmul.f32 %v1994_v27, %v1166_v15 }
 0x6b9   : > { %v1179_v30 = vmul.f32 %v1178_v26, %v1174_v28 }
 0x6bb   : > { %v1184_v31 = vadd.f32 %v1183_v29, %v1179_v30 }
 0x6bd   : > { %v1185_v32 = vpack.c.bf16 %v1184_v31, %v1184_v31 }
 0x6bf   : > { %1786 = vmatmul.mubr.msk.bf16.vlgmr.msra.gmra.mxu0 %vm577_vm2, %v1185_v32 }
 0x77f   : > { %v1243_v37 = vpop.f32.mrf.mxu0 }
 0x780   : > { %v1244_v38 = vadd.f32 %v1243_v37, %v1193_v36 }
 0x781   : > { %v1787_v39 = vpop.f32.mrf.mxu0 }
 0x782   : > { %v1249_v40 = vmax.f32 %v1244_v38, 0.0 }
 0x783   : > { %v1246_v41 = vpop.f32.mrf.mxu0 }
 0x784   : > { %v1250_v42 = vpack.c.bf16 %v1249_v40, %v1249_v40 }
 0x785   : > { %v1788_v43 = vpop.f32.mrf.mxu0 }
 0x786   : > { %1798 = vmatmul.mubr.msk.bf16.vlgmr.msra.gmra.mxu1 %vm1287_vm9, %v1250_v42 }
 0x846   : > { %v1325_v5 = vpop.f32.mrf.mxu1 }
 0x847   : > { %v1326_v46 = vadd.f32 %v1325_v5, %v1262_v45 }
 0x848   : > { %v1799_v47 = vpop.f32.mrf.mxu1 }
 0x849   : > { %v1331_v48 = vadd.f32 %v1326_v46, %v1184_v31 }
 0x84a   : > { %v1328_v49 = vpop.f32.mrf.mxu1 }
 0x84b   : > { %v1332_v50 = vsel %vm577_vm2, %v1331_v48, 0.0 }
 0x84c   : > { %1333 = vadd.xlane.f32.xlu0 %v1332_v50  ;;  %v1800_v51 = vpop.f32.mrf.mxu1 }
 0x8d5   : > { %v1334_v52 = vpop.xlane.xlu0 %1333 }
 0x8d6   : > { %v1335_v53 = vmul.f32 0.03125, %v1334_v52 }
 0x8d8   : > { %v1336_v54 = vsub.f32 %v1331_v48, %v1335_v53 }
 0x8da   : > { %v1337_v55 = vmul.f32 %v1336_v54, %v1336_v54 }
 0x8dc   : > { %v1338_v56 = vsel %vm577_vm2, %v1337_v55, 0.0 }
 0x8dd   : > { %1339 = vadd.xlane.f32.xlu0 %v1338_v56 }
 0x966   : > { %v1340_v57 = vpop.xlane.xlu0 %1339 }
 0x967   : > { %v1341_v58 = vmul.f32 0.03125, %v1340_v57 }
 0x969   : > { %v1342_v59 = vadd.f32 1e-05, %v1341_v58 }
 0x96b   : > { %1995 = vrsqrt.f32 %v1342_v59 }
 0x978   : > { %v1996_v63 = vpop.eup %1995 }
 0x979   : > { %v1344_v1 = vmul.f32 %v1996_v63, %v1336_v54 }
 0x97b   : > { %v1349_v2 = vmul.f32 %v1348_v62, %v1344_v1  ;;  %1359 = sbr.rel (%p1671_p3) target bundleno = 2640 (0xa50), region = 88 }
 0x97d   : > { %v1354_v3 = vadd.f32 %v1353_v0, %v1349_v2 }
 0x97f   : > { %1355 = vst.msk [vmem:[#allocation2] sm:$0xff] %vm577_vm2, %v1354_v3 }
 0x980   : > { %v1997_v4 = vld [vmem:[#allocation13 + $0x8] sm:$0xff]   ;;  %v2290_v6 = vmov 0.0   ;;  %v1998_v8 = vld [vmem:[#allocation13] sm:$0xff]   ;;  %vm2291_vm10 = vmmov 0   ;;  %v1360_v10 = vpack.c.bf16 %v1354_v3, %v1354_v3 }
 0x981   : > { %1801 = vmatprep.subr.bf16.mxu0 %v2290_v6  ;;  %1805 = vmatprep.mubr.msk.bf16.mxu0 %vm2291_vm10, %v2290_v6  ;;  %v1672_v12 = vld [vmem:[%s2845_s6] ss:$0 sm:$0xff] }
 0x982   : > { %1802 = vmatpush3.bf16.msra.mxu0 %v1997_v4 }
 0x983   : > { %1803 = vmatprep.subr.bf16.mxu0 %v2290_v6 }
 0x986   : > { %1804 = vmatpush3.bf16.msra.mxu0 %v1998_v8 }
 0x989   : > { %1806 = vmatmul.mubr.msk.bf16.vlgmr.msra.gmra.mxu0 %vm577_vm2, %v1360_v10 }
 0xa49   : > { %v1421_v9 = vpop.f32.mrf.mxu0 }
 0xa4a   : > { %v1422_v11 = vadd.f32 %v1672_v12, %v1421_v9 }
 0xa4b   : > { %v1807_v13 = vpop.f32.mrf.mxu0 }
 0xa4c   : > { %1427 = vst [vmem:[%s2592_s26] sm:$0xff] %v1422_v11 }
 0xa4d   : > { %v1424_v14 = vpop.f32.mrf.mxu0 }
 0xa4f   : > { %v1808_v15 = vpop.f32.mrf.mxu0 }
 0xa50 PF: > { %s2846_s19 = sld [smem:[#allocation21_spill]]  ;;  %s1442_s30 = sshll.u32 %s2592_s26, 4  ;;  %s1443_s30 = int_to_ptr.vmem [resolvable:$true] %s1442_s30 }
 0xa51   : > { %s2848_s11 = sld [smem:[#allocation36_spill]]  ;;  %s1429_s27 = scalar_lea.sflag [#allocation7], %s2546_s7 }
 0xa52   : > { %s2133_s9 = scalar_lea.vmem %s1443_s30, 128  ;;  %s2292_s0 = smov [#allocation14]  }
 0xa53   : > { %p2134_p6 = scmp.ne.s32.totalorder %s1443_s30, %s2133_s9  ;;  %s2137_s28 = sshll.u32 %s2292_s0, 4  ;;  %s2138_s28 = int_to_ptr.vmem [resolvable:$false] %s2137_s28 }
 0xa54   : > { %s2139_s2 = scalar_lea.vmem %s2138_s28, 256  ;;  %p2140_p8 = scmp.lt.s32.totalorder %s1443_s30, %s2138_s28 }
 0xa55   : > { %p2135_p13 = pnand %p2134_p6, %p2464_p11  ;;  %p2141_p0 = scmp.lt.s32.totalorder %s2139_s2, %s2133_s9 }
 0xa56   : > { %s1677_s5 = sshll.u32 %s2846_s19, 7 }
 0xa57   : > { %s1440_s16 = scalar_lea.hbm %s2848_s11, %s1677_s5  ;;  %p2136_p4 = pneg %p2135_p13 }
 0xa58   : > { %p2142_p12 = por %p2141_p0, %p2140_p8 }
 0xa5a   : > { %p2143_p5 = pnand %p2142_p12, %p2136_p4 }
 0xa5c   : > { %2146 = shalt.err (!%p2143_p5)
}
 0xa5d   : > { %s2147_s8 = scalar_lea.hbm %s1440_s16, 128  ;;  %s2151_s1 = scalar_lea.hbm %s2848_s11, 256 }
 0xa5e   : > { %p2148_p2 = scmp.ne.s32.totalorder %s1440_s16, %s2147_s8  ;;  %p2152_p1 = scmp.lt.s32.totalorder %s1440_s16, %s2848_s11 }
 0xa5f   : > { %p2153_p9 = scmp.lt.s32.totalorder %s2151_s1, %s2147_s8 }
 0xa60   : > { %p2149_p10 = pnand %p2148_p2, %p2464_p11 }
 0xa61   : > { %p2154_p3 = por %p2153_p9, %p2152_p1 }
 0xa62   : > { %p2150_p7 = pneg %p2149_p10 }
 0xa64   : > { %p2155_p6 = pnand %p2154_p3, %p2150_p7 }
 0xa66   : > { %2158 = shalt.err (!%p2155_p6)
}
 0xa67   : > { %1825 = dma.vmem_to_hbm [thread:$0]  (%p2464_p11), %s1443_s30, 128, %s1440_s16, %s1429_s27  }
 0xa68 PF: > { %s2849_s21 = sld [smem:[#allocation20_spill]]  ;;  %p1855_p13 = scmp.ge.s32.totalorder %s2265_s23, 2 }
 0xa69   : > { %s2850_s20 = sld [smem:[#allocation25_spill]] }
 0xa6e   : > { %s1454_s6 = sand.u32 1, %s2849_s21  }
 0xa6f   : > { %p2851_p4 = scmp.ne.s32.totalorder %s2850_s20, 0  ;;  %s1455_s19 = scalar_lea.sflag [#allocation7], %s1454_s6 }
 0xa71   : > { %p1845_p8 = pnand %p1855_p13, %p2851_p4 }
 0xa73   : > { %p1846_p0 = pneg %p1845_p8 }
 0xa75   : > { %2220 = dma.done.wait (%p1846_p0), %s1455_s19, 128  }
 0xa76   : > { %2222 = vsyncadd (%p1846_p0), %s1455_s19, 4294967168  ;;  %s30_s23 = sadd.s32 1, %s2265_s23   ;;  %s2852_s5 = smov %s2517_s13 }
 0xa77   : > { %p27_p12 = scmp.ge.s32.totalorder %s30_s23, 6   ;;  %s2853_s19 = sld [smem:[#allocation22_spill]] }
 0xa78   : > { %s2854_s20 = sld [smem:[#allocation23_spill]]  ;;  %s2857_s13 = smov %s2229_s14 }
 0xa79   : > { %s2855_s21 = sld [smem:[#allocation26_spill]]  ;;  %s2858_s14 = smov %s2233_s15 }
 0xa7a   : > { %s2856_s22 = sld [smem:[#allocation27_spill]]  ;;  %s2859_s15 = smov %s2852_s5 }
 0xa7b   : > { %s2860_s16 = smov %s2241_s17  ;;  %s2861_s17 = smov %s2245_s18 }
 0xa7c   : > { %s2862_s18 = smov %s2526_s29  ;;  %29 = sbr.rel (!%p27_p12) target bundleno = 22 (0x16), region = 150 }
 0xa81   :  { %1460 = vsyncpa [#allocation6], 1 }
 0xa82   :  { %1462 = vsyncpa [#allocation6 + $0x1], 1 }
 0xa83   :  { %1463 = vsyncpa [#allocation9], 1 }
 0xa84   :  { %1464 = vsyncpa [#allocation12], 1 }
 0xa85   :  { %1466 = vsyncpa [#allocation12 + $0x1], 1 }
 0xa86   :  { %1467 = vsyncpa [#allocation7], 1 }
 0xa87   :  { %1469 = vsyncpa [#allocation7 + $0x1], 1 }

</bundles_post_ra>
